<compile_context>
chip_gen: v7x
topology: tpu7x:2x2x1
jax: 0.10.0
libtpu: 0.0.40
codegen_flags: <defaults>
</compile_context>

<pallas_src>
import math
import functools

import jax
import jax.numpy as jnp
from jax.experimental import pallas as pl
from jax.experimental.pallas import tpu as pltpu


def _choose_ff_tile(d_ff, max_tile=512):
    """Largest tile <= max_tile (multiple of 128) that divides d_ff; else d_ff."""
    if d_ff <= max_tile:
        return d_ff
    for t in range(max_tile, 127, -128):
        if d_ff % t == 0:
            return t
    return d_ff


# -----------------------------------------------------------------------------
# Fused kernel, grid = (batch, d_ff tiles):
#   kf == 0 : LN1 -> QKV -> MHSA -> out proj -> +res -> LN2 (cached) -> init acc
#   every kf: acc += relu(xn2 @ W1_tile + b1_tile) @ W2_tile
#   last kf : o = acc
# -----------------------------------------------------------------------------
def _block_kernel(x_ref,
                  ln1_g_ref, ln1_b_ref,
                  wqkv_ref, bqkv_ref,
                  wo_ref, bo_ref,
                  ln2_g_ref, ln2_b_ref,
                  w1_ref, b1_ref,
                  w2_ref, b2_ref,
                  o_ref,
                  xn2_s, acc_s,
                  *, num_heads, head_dim, seq):
    H, Dh, S = num_heads, head_dim, seq
    E = H * Dh
    kf = pl.program_id(1)

    # ---- Phase 1 (once per batch row-block): attention + both LayerNorms ----
    @pl.when(kf == 0)
    def _attn_phase():
        x = x_ref[...]                                            # (S, E) f32

        # LayerNorm 1 (f32, eps=1e-6, biased variance — matches nn.LayerNorm).
        mu = jnp.mean(x, axis=-1, keepdims=True)
        var = jnp.mean((x - mu) ** 2, axis=-1, keepdims=True)
        xn = (x - mu) * jax.lax.rsqrt(var + 1e-6) * ln1_g_ref[0] + ln1_b_ref[0]

        # Fused QKV projection (bf16 operands, f32 accumulation).
        # 1/sqrt(head_dim) is already folded into the Wq / bq columns.
        qkv = jnp.dot(xn.astype(wqkv_ref.dtype), wqkv_ref[...],
                      preferred_element_type=jnp.float32) + bqkv_ref[0]
        qkv = qkv.astype(jnp.bfloat16)                            # MXU operand dtype
        q = qkv[:, 0 * E:1 * E]
        k = qkv[:, 1 * E:2 * E]
        v = qkv[:, 2 * E:3 * E]

        # Per-head attention; each head's context folds straight into the output
        # projection (no ctx scratch, no narrow lane-slice stores).
        attn = jnp.zeros((S, E), jnp.float32)
        for h in range(H):
            lo = h * Dh
            qh = q[:, lo:lo + Dh]                                 # (S, Dh) bf16
            kh = k[:, lo:lo + Dh]
            vh = v[:, lo:lo + Dh]
            s = jnp.einsum("qd,kd->qk", qh, kh,
                           preferred_element_type=jnp.float32)    # (S, S), pre-scaled
            m = jnp.max(s, axis=-1, keepdims=True)
            e = jnp.exp(s - m)
            p = e * pl.reciprocal(jnp.sum(e, axis=-1, keepdims=True), approx=True)
            # attn_dropout: identity at inference
            ctx_h = jnp.dot(p.astype(jnp.bfloat16), vh,
                            preferred_element_type=jnp.float32)   # (S, Dh)
            attn = attn + jnp.dot(ctx_h.astype(wo_ref.dtype), wo_ref[lo:lo + Dh, :],
                                  preferred_element_type=jnp.float32)

        # proj_dropout: identity at inference
        x1 = attn + bo_ref[0] + x                                 # residual 1

        # LayerNorm 2; cache as bf16 (only ever used as an MXU operand).
        mu2 = jnp.mean(x1, axis=-1, keepdims=True)
        var2 = jnp.mean((x1 - mu2) ** 2, axis=-1, keepdims=True)
        xn2 = (x1 - mu2) * jax.lax.rsqrt(var2 + 1e-6) * ln2_g_ref[0] + ln2_b_ref[0]
        xn2_s[...] = xn2.astype(xn2_s.dtype)

        # Init FFN accumulator with residual + final FFN bias.
        acc_s[...] = x1 + b2_ref[0]

    # ---- Phase 2 (every kf): one d_ff tile of the FFN ----
    h1 = jnp.dot(xn2_s[...], w1_ref[...],
                 preferred_element_type=jnp.float32) + b1_ref[0]
    h1 = jnp.maximum(h1, 0.0)                                     # ReLU; FFN dropout identity
    acc_s[...] += jnp.dot(h1.astype(w2_ref.dtype), w2_ref[...],
                          preferred_element_type=jnp.float32)

    @pl.when(kf == pl.num_programs(1) - 1)
    def _finalize():
        o_ref[...] = acc_s[...]                                   # residual 2 already in acc


# -----------------------------------------------------------------------------
# Wrapper
# -----------------------------------------------------------------------------
def block_forward(x, params, *, num_heads, weight_dtype=jnp.bfloat16, ff_tile=512):
    B, S, E = x.shape
    assert E % num_heads == 0
    head_dim = E // num_heads
    d_ff = params["w1"].shape[1]
    scale = 1.0 / math.sqrt(head_dim)

    tf = _choose_ff_tile(d_ff, ff_tile)
    n_kf = d_ff // tf

    # Pack QKV into one (E, 3E) weight; fold the attention score scale into Wq/bq.
    wqkv = jnp.concatenate(
        [params["wq"] * scale, params["wk"], params["wv"]], axis=1).astype(weight_dtype)
    bqkv = jnp.concatenate(
        [params["bq"] * scale, params["bk"], params["bv"]], axis=1).astype(jnp.float32)
    wo = params["wo"].astype(weight_dtype)
    w1 = params["w1"].astype(weight_dtype)
    w2 = params["w2"].astype(weight_dtype)

    kernel = functools.partial(_block_kernel, num_heads=num_heads, head_dim=head_dim,
                               seq=S)

    # Constant (VMEM-resident) blocks.
    def const2(shape):
        return pl.BlockSpec(shape, lambda b, k: (0, 0))

    row_spec = pl.BlockSpec((None, S, E), lambda b, k: (b, 0, 0))   # per-batch row block

    out = pl.pallas_call(
        kernel,
        out_shape=jax.ShapeDtypeStruct((B, S, E), jnp.float32),
        grid=(B, n_kf),
        in_specs=[
            row_spec,                                   # x
            const2((1, E)), const2((1, E)),             # ln1 gamma / beta
            const2((E, 3 * E)), const2((1, 3 * E)),     # packed Wqkv (bf16), bqkv
            const2((E, E)), const2((1, E)),             # Wo (bf16), bo
            const2((1, E)), const2((1, E)),             # ln2 gamma / beta
            pl.BlockSpec((E, tf), lambda b, k: (0, k)), # W1 d_ff tile (bf16, streamed)
            pl.BlockSpec((1, tf), lambda b, k: (0, k)), # b1 d_ff tile
            pl.BlockSpec((tf, E), lambda b, k: (k, 0)), # W2 d_ff tile (bf16, streamed)
            const2((1, E)),                             # b2
        ],
        out_specs=row_spec,
        scratch_shapes=[
            pltpu.VMEM((S, E), jnp.bfloat16),           # cached LN2 activations (MXU operand)
            pltpu.VMEM((S, E), jnp.float32),            # FFN / residual accumulator
        ],
        compiler_params=pltpu.CompilerParams(
            dimension_semantics=("parallel", "arbitrary")),
    )(x,
      params["ln1_g"], params["ln1_b"],
      wqkv, bqkv,
      wo, params["bo"],
      params["ln2_g"], params["ln2_b"],
      w1, params["b1"],
      w2, params["b2"])

    return out, None   # (output, attention weights) — vis=False => None


# -----------------------------------------------------------------------------
# Pure-JAX f32 reference (for verification)
# -----------------------------------------------------------------------------
def _reference(x, params, *, num_heads):
    B, S, E = x.shape
    Dh = E // num_heads

    def ln(v, g, b):
        mu = jnp.mean(v, -1, keepdims=True)
        var = jnp.mean((v - mu) ** 2, -1, keepdims=True)
        return (v - mu) / jnp.sqrt(var + 1e-6) * g[0] + b[0]

    h = x
    xn = ln(x, params["ln1_g"], params["ln1_b"])
    q = xn @ params["wq"] + params["bq"][0]
    k = xn @ params["wk"] + params["bk"][0]
    v = xn @ params["wv"] + params["bv"][0]
    q = q.reshape(B, S, num_heads, Dh).transpose(0, 2, 1, 3)
    k = k.reshape(B, S, num_heads, Dh).transpose(0, 2, 1, 3)
    v = v.reshape(B, S, num_heads, Dh).transpose(0, 2, 1, 3)
    s = jnp.einsum("bhqd,bhkd->bhqk", q, k) / math.sqrt(Dh)
    p = jax.nn.softmax(s, axis=-1)
    ctx = jnp.einsum("bhqk,bhkd->bhqd", p, v).transpose(0, 2, 1, 3).reshape(B, S, E)
    x1 = ctx @ params["wo"] + params["bo"][0] + h

    h = x1
    xn = ln(x1, params["ln2_g"], params["ln2_b"])
    y = jnp.maximum(xn @ params["w1"] + params["b1"][0], 0.0) @ params["w2"] + params["b2"][0]
    return y + h


# -----------------------------------------------------------------------------
# Main
# -----------------------------------------------------------------------------
if __name__ == "__main__":
    B, S, E = 2, 8, 32
    num_heads = 4
    d_ff = 2048                      # PositionwiseFeedForward(embed_dim, 2048)

    key = jax.random.PRNGKey(0)
    keys = jax.random.split(key, 16)

    def w(k, shape, scale=0.02):
        return (scale * jax.random.normal(k, shape)).astype(jnp.float32)

    params = {
        "ln1_g": jnp.ones((1, E), jnp.float32),
        "ln1_b": jnp.zeros((1, E), jnp.float32),
        "ln2_g": jnp.ones((1, E), jnp.float32),
        "ln2_b": jnp.zeros((1, E), jnp.float32),
        "wq": w(keys[0], (E, E)), "bq": w(keys[1], (1, E)),
        "wk": w(keys[2], (E, E)), "bk": w(keys[3], (1, E)),
        "wv": w(keys[4], (E, E)), "bv": w(keys[5], (1, E)),
        "wo": w(keys[6], (E, E)), "bo": w(keys[7], (1, E)),
        "w1": w(keys[8], (E, d_ff)), "b1": w(keys[9], (1, d_ff)),
        "w2": w(keys[10], (d_ff, E)), "b2": w(keys[11], (1, E)),
    }

    x = jax.random.normal(keys[12], (B, S, E), dtype=jnp.float32)

    out, weights = block_forward(x, params, num_heads=num_heads)
    out = jax.block_until_ready(out)

    ref = _reference(x, params, num_heads=num_heads)
    assert out.shape == (B, S, E)
    assert weights is None
    # bf16 weights + bf16 matmul operands (f32 accumulation) vs f32 reference.
    assert jnp.allclose(out, ref, atol=1e-2, rtol=1e-2), "mismatch vs reference"

    print("KERNEL_OK")
</pallas_src>

<mosaic_0001>
module attributes {stable_mosaic.version = 11 : i64} {
  func.func @_block_kernel(%arg0: i32, %arg1: i32, %arg2: memref<1x8x32xf32, #tpu.memory_space<vmem>>, %arg3: memref<1x32xf32, #tpu.memory_space<vmem>>, %arg4: memref<1x32xf32, #tpu.memory_space<vmem>>, %arg5: memref<32x96xbf16, #tpu.memory_space<vmem>>, %arg6: memref<1x96xf32, #tpu.memory_space<vmem>>, %arg7: memref<32x32xbf16, #tpu.memory_space<vmem>>, %arg8: memref<1x32xf32, #tpu.memory_space<vmem>>, %arg9: memref<1x32xf32, #tpu.memory_space<vmem>>, %arg10: memref<1x32xf32, #tpu.memory_space<vmem>>, %arg11: memref<32x512xbf16, #tpu.memory_space<vmem>>, %arg12: memref<1x512xf32, #tpu.memory_space<vmem>>, %arg13: memref<512x32xbf16, #tpu.memory_space<vmem>>, %arg14: memref<1x32xf32, #tpu.memory_space<vmem>>, %arg15: memref<1x8x32xf32, #tpu.memory_space<vmem>>, %arg16: memref<8x32xbf16, #tpu.memory_space<vmem>>, %arg17: memref<8x32xf32, #tpu.memory_space<vmem>>) attributes {dimension_semantics = [#tpu.dimension_semantics<parallel>, #tpu.dimension_semantics<arbitrary>], iteration_bounds = array<i64: 2, 4>, scalar_prefetch = 0 : i64, scratch_operands = 2 : i64, tpu.core_type = #tpu.core_type<tc>, window_params = [{transform_indices = @transform_0, window_bounds = array<i64: 1, 8, 32>}, {pipeline_mode = #tpu.pipeline_mode<synchronous>, transform_indices = @transform_1, window_bounds = array<i64: 1, 32>}, {pipeline_mode = #tpu.pipeline_mode<synchronous>, transform_indices = @transform_2, window_bounds = array<i64: 1, 32>}, {pipeline_mode = #tpu.pipeline_mode<synchronous>, transform_indices = @transform_3, window_bounds = array<i64: 32, 96>}, {pipeline_mode = #tpu.pipeline_mode<synchronous>, transform_indices = @transform_4, window_bounds = array<i64: 1, 96>}, {pipeline_mode = #tpu.pipeline_mode<synchronous>, transform_indices = @transform_5, window_bounds = array<i64: 32, 32>}, {pipeline_mode = #tpu.pipeline_mode<synchronous>, transform_indices = @transform_6, window_bounds = array<i64: 1, 32>}, {pipeline_mode = #tpu.pipeline_mode<synchronous>, transform_indices = @transform_7, window_bounds = array<i64: 1, 32>}, {pipeline_mode = #tpu.pipeline_mode<synchronous>, transform_indices = @transform_8, window_bounds = array<i64: 1, 32>}, {transform_indices = @transform_9, window_bounds = array<i64: 32, 512>}, {transform_indices = @transform_10, window_bounds = array<i64: 1, 512>}, {transform_indices = @transform_11, window_bounds = array<i64: 512, 32>}, {pipeline_mode = #tpu.pipeline_mode<synchronous>, transform_indices = @transform_12, window_bounds = array<i64: 1, 32>}, {transform_indices = @transform_13, window_bounds = array<i64: 1, 8, 32>}]} {
    %c0_i32 = arith.constant 0 : i32
    %0 = arith.cmpi eq, %arg1, %c0_i32 : i32
    %1 = arith.extui %0 : i1 to i32
    %c0_i32_0 = arith.constant 0 : i32
    %2 = arith.cmpi ne, %1, %c0_i32_0 : i32
    scf.if %2 {
      %c0_15 = arith.constant 0 : index
      %c0_16 = arith.constant 0 : index
      %c0_17 = arith.constant 0 : index
      %22 = vector.load %arg2[%c0_15, %c0_16, %c0_17] : memref<1x8x32xf32, #tpu.memory_space<vmem>>, vector<1x8x32xf32>
      %23 = vector.shape_cast %22 : vector<1x8x32xf32> to vector<8x32xf32>
      %cst_18 = arith.constant dense<0.000000e+00> : vector<8xf32>
      %24 = vector.multi_reduction <add>, %23, %cst_18 [1] : vector<8x32xf32> to vector<8xf32>
      %25 = vector.shape_cast %24 : vector<8xf32> to vector<8x1xf32>
      %cst_19 = arith.constant 3.200000e+01 : f32
      %26 = vector.broadcast %cst_19 : f32 to vector<8x1xf32>
      %27 = arith.divf %25, %26 : vector<8x1xf32>
      %28 = vector.broadcast %27 : vector<8x1xf32> to vector<8x32xf32>
      %29 = arith.subf %23, %28 : vector<8x32xf32>
      %30 = arith.mulf %29, %29 : vector<8x32xf32>
      %cst_20 = arith.constant dense<0.000000e+00> : vector<8xf32>
      %31 = vector.multi_reduction <add>, %30, %cst_20 [1] : vector<8x32xf32> to vector<8xf32>
      %32 = vector.shape_cast %31 : vector<8xf32> to vector<8x1xf32>
      %cst_21 = arith.constant 3.200000e+01 : f32
      %33 = vector.broadcast %cst_21 : f32 to vector<8x1xf32>
      %34 = arith.divf %32, %33 : vector<8x1xf32>
      %35 = vector.broadcast %27 : vector<8x1xf32> to vector<8x32xf32>
      %36 = arith.subf %23, %35 : vector<8x32xf32>
      %cst_22 = arith.constant 9.99999997E-7 : f32
      %37 = vector.broadcast %cst_22 : f32 to vector<8x1xf32>
      %38 = arith.addf %34, %37 : vector<8x1xf32>
      %39 = math.rsqrt %38 : vector<8x1xf32>
      %40 = vector.broadcast %39 : vector<8x1xf32> to vector<8x32xf32>
      %41 = arith.mulf %36, %40 : vector<8x32xf32>
      %c0_23 = arith.constant 0 : index
      %c0_24 = arith.constant 0 : index
      %42 = vector.load %arg3[%c0_23, %c0_24] : memref<1x32xf32, #tpu.memory_space<vmem>>, vector<1x32xf32>
      %43 = vector.shape_cast %42 : vector<1x32xf32> to vector<32xf32>
      %44 = vector.shape_cast %43 : vector<32xf32> to vector<1x32xf32>
      %45 = vector.broadcast %44 : vector<1x32xf32> to vector<8x32xf32>
      %46 = arith.mulf %41, %45 : vector<8x32xf32>
      %c0_25 = arith.constant 0 : index
      %c0_26 = arith.constant 0 : index
      %47 = vector.load %arg4[%c0_25, %c0_26] : memref<1x32xf32, #tpu.memory_space<vmem>>, vector<1x32xf32>
      %48 = vector.shape_cast %47 : vector<1x32xf32> to vector<32xf32>
      %49 = vector.shape_cast %48 : vector<32xf32> to vector<1x32xf32>
      %50 = vector.broadcast %49 : vector<1x32xf32> to vector<8x32xf32>
      %51 = arith.addf %46, %50 : vector<8x32xf32>
      %52 = arith.truncf %51 : vector<8x32xf32> to vector<8x32xbf16>
      %c0_27 = arith.constant 0 : index
      %c0_28 = arith.constant 0 : index
      %53 = vector.load %arg5[%c0_27, %c0_28] : memref<32x96xbf16, #tpu.memory_space<vmem>>, vector<32x96xbf16>
      %cst_29 = arith.constant dense<0.000000e+00> : vector<8x96xf32>
      %54 = tpu.matmul %52, %53, %cst_29 {dimension_numbers = #tpu.dot_dimension_numbers<[1], [0], [0], [1], [0, 0, 1, 1], [], []>} : vector<8x32xbf16>, vector<32x96xbf16>, vector<8x96xf32> -> vector<8x96xf32>
      %c0_30 = arith.constant 0 : index
      %c0_31 = arith.constant 0 : index
      %55 = vector.load %arg6[%c0_30, %c0_31] : memref<1x96xf32, #tpu.memory_space<vmem>>, vector<1x96xf32>
      %56 = vector.shape_cast %55 : vector<1x96xf32> to vector<96xf32>
      %57 = vector.shape_cast %56 : vector<96xf32> to vector<1x96xf32>
      %58 = vector.broadcast %57 : vector<1x96xf32> to vector<8x96xf32>
      %59 = arith.addf %54, %58 : vector<8x96xf32>
      %60 = arith.truncf %59 : vector<8x96xf32> to vector<8x96xbf16>
      %61 = vector.extract_strided_slice %60 {offsets = [0, 0], sizes = [8, 32], strides = [1, 1]} : vector<8x96xbf16> to vector<8x32xbf16>
      %62 = vector.extract_strided_slice %60 {offsets = [0, 32], sizes = [8, 32], strides = [1, 1]} : vector<8x96xbf16> to vector<8x32xbf16>
      %63 = vector.extract_strided_slice %60 {offsets = [0, 64], sizes = [8, 32], strides = [1, 1]} : vector<8x96xbf16> to vector<8x32xbf16>
      %cst_32 = arith.constant 0.000000e+00 : f32
      %64 = vector.broadcast %cst_32 : f32 to vector<8x32xf32>
      %65 = vector.extract_strided_slice %61 {offsets = [0, 0], sizes = [8, 8], strides = [1, 1]} : vector<8x32xbf16> to vector<8x8xbf16>
      %66 = vector.extract_strided_slice %62 {offsets = [0, 0], sizes = [8, 8], strides = [1, 1]} : vector<8x32xbf16> to vector<8x8xbf16>
      %67 = vector.extract_strided_slice %63 {offsets = [0, 0], sizes = [8, 8], strides = [1, 1]} : vector<8x32xbf16> to vector<8x8xbf16>
      "tpu.trace_start"() <{level = 10 : i32, message = "qd,kd->qk"}> : () -> ()
      %cst_33 = arith.constant dense<0.000000e+00> : vector<8x8xf32>
      %68 = tpu.matmul %65, %66, %cst_33 {dimension_numbers = #tpu.dot_dimension_numbers<[1], [1], [0], [0], [0, 0, 1, 0], [], []>} : vector<8x8xbf16>, vector<8x8xbf16>, vector<8x8xf32> -> vector<8x8xf32>
      "tpu.trace_stop"() : () -> ()
      %cst_34 = arith.constant dense<0xFF800000> : vector<8xf32>
      %69 = vector.multi_reduction <maximumf>, %68, %cst_34 [1] : vector<8x8xf32> to vector<8xf32>
      %70 = vector.shape_cast %69 : vector<8xf32> to vector<8x1xf32>
      %71 = vector.broadcast %70 : vector<8x1xf32> to vector<8x8xf32>
      %72 = arith.subf %68, %71 : vector<8x8xf32>
      %73 = math.exp %72 : vector<8x8xf32>
      %cst_35 = arith.constant dense<0.000000e+00> : vector<8xf32>
      %74 = vector.multi_reduction <add>, %73, %cst_35 [1] : vector<8x8xf32> to vector<8xf32>
      %75 = vector.shape_cast %74 : vector<8xf32> to vector<8x1xf32>
      %76 = tpu.reciprocal %75 {approx = true} : vector<8x1xf32> -> vector<8x1xf32>
      %77 = vector.broadcast %76 : vector<8x1xf32> to vector<8x8xf32>
      %78 = arith.mulf %73, %77 : vector<8x8xf32>
      %79 = arith.truncf %78 : vector<8x8xf32> to vector<8x8xbf16>
      %cst_36 = arith.constant dense<0.000000e+00> : vector<8x8xf32>
      %80 = tpu.matmul %79, %67, %cst_36 {dimension_numbers = #tpu.dot_dimension_numbers<[1], [0], [0], [1], [0, 0, 1, 1], [], []>} : vector<8x8xbf16>, vector<8x8xbf16>, vector<8x8xf32> -> vector<8x8xf32>
      %81 = arith.truncf %80 : vector<8x8xf32> to vector<8x8xbf16>
      %c0_37 = arith.constant 0 : index
      %c0_38 = arith.constant 0 : index
      %82 = vector.load %arg7[%c0_37, %c0_38] : memref<32x32xbf16, #tpu.memory_space<vmem>>, vector<8x32xbf16>
      %cst_39 = arith.constant dense<0.000000e+00> : vector<8x32xf32>
      %83 = tpu.matmul %81, %82, %cst_39 {dimension_numbers = #tpu.dot_dimension_numbers<[1], [0], [0], [1], [0, 0, 1, 1], [], []>} : vector<8x8xbf16>, vector<8x32xbf16>, vector<8x32xf32> -> vector<8x32xf32>
      %84 = arith.addf %64, %83 : vector<8x32xf32>
      %85 = vector.extract_strided_slice %61 {offsets = [0, 8], sizes = [8, 8], strides = [1, 1]} : vector<8x32xbf16> to vector<8x8xbf16>
      %86 = vector.extract_strided_slice %62 {offsets = [0, 8], sizes = [8, 8], strides = [1, 1]} : vector<8x32xbf16> to vector<8x8xbf16>
      %87 = vector.extract_strided_slice %63 {offsets = [0, 8], sizes = [8, 8], strides = [1, 1]} : vector<8x32xbf16> to vector<8x8xbf16>
      "tpu.trace_start"() <{level = 10 : i32, message = "qd,kd->qk"}> : () -> ()
      %cst_40 = arith.constant dense<0.000000e+00> : vector<8x8xf32>
      %88 = tpu.matmul %85, %86, %cst_40 {dimension_numbers = #tpu.dot_dimension_numbers<[1], [1], [0], [0], [0, 0, 1, 0], [], []>} : vector<8x8xbf16>, vector<8x8xbf16>, vector<8x8xf32> -> vector<8x8xf32>
      "tpu.trace_stop"() : () -> ()
      %cst_41 = arith.constant dense<0xFF800000> : vector<8xf32>
      %89 = vector.multi_reduction <maximumf>, %88, %cst_41 [1] : vector<8x8xf32> to vector<8xf32>
      %90 = vector.shape_cast %89 : vector<8xf32> to vector<8x1xf32>
      %91 = vector.broadcast %90 : vector<8x1xf32> to vector<8x8xf32>
      %92 = arith.subf %88, %91 : vector<8x8xf32>
      %93 = math.exp %92 : vector<8x8xf32>
      %cst_42 = arith.constant dense<0.000000e+00> : vector<8xf32>
      %94 = vector.multi_reduction <add>, %93, %cst_42 [1] : vector<8x8xf32> to vector<8xf32>
      %95 = vector.shape_cast %94 : vector<8xf32> to vector<8x1xf32>
      %96 = tpu.reciprocal %95 {approx = true} : vector<8x1xf32> -> vector<8x1xf32>
      %97 = vector.broadcast %96 : vector<8x1xf32> to vector<8x8xf32>
      %98 = arith.mulf %93, %97 : vector<8x8xf32>
      %99 = arith.truncf %98 : vector<8x8xf32> to vector<8x8xbf16>
      %cst_43 = arith.constant dense<0.000000e+00> : vector<8x8xf32>
      %100 = tpu.matmul %99, %87, %cst_43 {dimension_numbers = #tpu.dot_dimension_numbers<[1], [0], [0], [1], [0, 0, 1, 1], [], []>} : vector<8x8xbf16>, vector<8x8xbf16>, vector<8x8xf32> -> vector<8x8xf32>
      %101 = arith.truncf %100 : vector<8x8xf32> to vector<8x8xbf16>
      %c8 = arith.constant 8 : index
      %c0_44 = arith.constant 0 : index
      %102 = vector.load %arg7[%c8, %c0_44] : memref<32x32xbf16, #tpu.memory_space<vmem>>, vector<8x32xbf16>
      %cst_45 = arith.constant dense<0.000000e+00> : vector<8x32xf32>
      %103 = tpu.matmul %101, %102, %cst_45 {dimension_numbers = #tpu.dot_dimension_numbers<[1], [0], [0], [1], [0, 0, 1, 1], [], []>} : vector<8x8xbf16>, vector<8x32xbf16>, vector<8x32xf32> -> vector<8x32xf32>
      %104 = arith.addf %84, %103 : vector<8x32xf32>
      %105 = vector.extract_strided_slice %61 {offsets = [0, 16], sizes = [8, 8], strides = [1, 1]} : vector<8x32xbf16> to vector<8x8xbf16>
      %106 = vector.extract_strided_slice %62 {offsets = [0, 16], sizes = [8, 8], strides = [1, 1]} : vector<8x32xbf16> to vector<8x8xbf16>
      %107 = vector.extract_strided_slice %63 {offsets = [0, 16], sizes = [8, 8], strides = [1, 1]} : vector<8x32xbf16> to vector<8x8xbf16>
      "tpu.trace_start"() <{level = 10 : i32, message = "qd,kd->qk"}> : () -> ()
      %cst_46 = arith.constant dense<0.000000e+00> : vector<8x8xf32>
      %108 = tpu.matmul %105, %106, %cst_46 {dimension_numbers = #tpu.dot_dimension_numbers<[1], [1], [0], [0], [0, 0, 1, 0], [], []>} : vector<8x8xbf16>, vector<8x8xbf16>, vector<8x8xf32> -> vector<8x8xf32>
      "tpu.trace_stop"() : () -> ()
      %cst_47 = arith.constant dense<0xFF800000> : vector<8xf32>
      %109 = vector.multi_reduction <maximumf>, %108, %cst_47 [1] : vector<8x8xf32> to vector<8xf32>
      %110 = vector.shape_cast %109 : vector<8xf32> to vector<8x1xf32>
      %111 = vector.broadcast %110 : vector<8x1xf32> to vector<8x8xf32>
      %112 = arith.subf %108, %111 : vector<8x8xf32>
      %113 = math.exp %112 : vector<8x8xf32>
      %cst_48 = arith.constant dense<0.000000e+00> : vector<8xf32>
      %114 = vector.multi_reduction <add>, %113, %cst_48 [1] : vector<8x8xf32> to vector<8xf32>
      %115 = vector.shape_cast %114 : vector<8xf32> to vector<8x1xf32>
      %116 = tpu.reciprocal %115 {approx = true} : vector<8x1xf32> -> vector<8x1xf32>
      %117 = vector.broadcast %116 : vector<8x1xf32> to vector<8x8xf32>
      %118 = arith.mulf %113, %117 : vector<8x8xf32>
      %119 = arith.truncf %118 : vector<8x8xf32> to vector<8x8xbf16>
      %cst_49 = arith.constant dense<0.000000e+00> : vector<8x8xf32>
      %120 = tpu.matmul %119, %107, %cst_49 {dimension_numbers = #tpu.dot_dimension_numbers<[1], [0], [0], [1], [0, 0, 1, 1], [], []>} : vector<8x8xbf16>, vector<8x8xbf16>, vector<8x8xf32> -> vector<8x8xf32>
      %121 = arith.truncf %120 : vector<8x8xf32> to vector<8x8xbf16>
      %c16 = arith.constant 16 : index
      %c0_50 = arith.constant 0 : index
      %122 = vector.load %arg7[%c16, %c0_50] : memref<32x32xbf16, #tpu.memory_space<vmem>>, vector<8x32xbf16>
      %cst_51 = arith.constant dense<0.000000e+00> : vector<8x32xf32>
      %123 = tpu.matmul %121, %122, %cst_51 {dimension_numbers = #tpu.dot_dimension_numbers<[1], [0], [0], [1], [0, 0, 1, 1], [], []>} : vector<8x8xbf16>, vector<8x32xbf16>, vector<8x32xf32> -> vector<8x32xf32>
      %124 = arith.addf %104, %123 : vector<8x32xf32>
      %125 = vector.extract_strided_slice %61 {offsets = [0, 24], sizes = [8, 8], strides = [1, 1]} : vector<8x32xbf16> to vector<8x8xbf16>
      %126 = vector.extract_strided_slice %62 {offsets = [0, 24], sizes = [8, 8], strides = [1, 1]} : vector<8x32xbf16> to vector<8x8xbf16>
      %127 = vector.extract_strided_slice %63 {offsets = [0, 24], sizes = [8, 8], strides = [1, 1]} : vector<8x32xbf16> to vector<8x8xbf16>
      "tpu.trace_start"() <{level = 10 : i32, message = "qd,kd->qk"}> : () -> ()
      %cst_52 = arith.constant dense<0.000000e+00> : vector<8x8xf32>
      %128 = tpu.matmul %125, %126, %cst_52 {dimension_numbers = #tpu.dot_dimension_numbers<[1], [1], [0], [0], [0, 0, 1, 0], [], []>} : vector<8x8xbf16>, vector<8x8xbf16>, vector<8x8xf32> -> vector<8x8xf32>
      "tpu.trace_stop"() : () -> ()
      %cst_53 = arith.constant dense<0xFF800000> : vector<8xf32>
      %129 = vector.multi_reduction <maximumf>, %128, %cst_53 [1] : vector<8x8xf32> to vector<8xf32>
      %130 = vector.shape_cast %129 : vector<8xf32> to vector<8x1xf32>
      %131 = vector.broadcast %130 : vector<8x1xf32> to vector<8x8xf32>
      %132 = arith.subf %128, %131 : vector<8x8xf32>
      %133 = math.exp %132 : vector<8x8xf32>
      %cst_54 = arith.constant dense<0.000000e+00> : vector<8xf32>
      %134 = vector.multi_reduction <add>, %133, %cst_54 [1] : vector<8x8xf32> to vector<8xf32>
      %135 = vector.shape_cast %134 : vector<8xf32> to vector<8x1xf32>
      %136 = tpu.reciprocal %135 {approx = true} : vector<8x1xf32> -> vector<8x1xf32>
      %137 = vector.broadcast %136 : vector<8x1xf32> to vector<8x8xf32>
      %138 = arith.mulf %133, %137 : vector<8x8xf32>
      %139 = arith.truncf %138 : vector<8x8xf32> to vector<8x8xbf16>
      %cst_55 = arith.constant dense<0.000000e+00> : vector<8x8xf32>
      %140 = tpu.matmul %139, %127, %cst_55 {dimension_numbers = #tpu.dot_dimension_numbers<[1], [0], [0], [1], [0, 0, 1, 1], [], []>} : vector<8x8xbf16>, vector<8x8xbf16>, vector<8x8xf32> -> vector<8x8xf32>
      %141 = arith.truncf %140 : vector<8x8xf32> to vector<8x8xbf16>
      %c24 = arith.constant 24 : index
      %c0_56 = arith.constant 0 : index
      %142 = vector.load %arg7[%c24, %c0_56] : memref<32x32xbf16, #tpu.memory_space<vmem>>, vector<8x32xbf16>
      %cst_57 = arith.constant dense<0.000000e+00> : vector<8x32xf32>
      %143 = tpu.matmul %141, %142, %cst_57 {dimension_numbers = #tpu.dot_dimension_numbers<[1], [0], [0], [1], [0, 0, 1, 1], [], []>} : vector<8x8xbf16>, vector<8x32xbf16>, vector<8x32xf32> -> vector<8x32xf32>
      %144 = arith.addf %124, %143 : vector<8x32xf32>
      %c0_58 = arith.constant 0 : index
      %c0_59 = arith.constant 0 : index
      %145 = vector.load %arg8[%c0_58, %c0_59] : memref<1x32xf32, #tpu.memory_space<vmem>>, vector<1x32xf32>
      %146 = vector.shape_cast %145 : vector<1x32xf32> to vector<32xf32>
      %147 = vector.shape_cast %146 : vector<32xf32> to vector<1x32xf32>
      %148 = vector.broadcast %147 : vector<1x32xf32> to vector<8x32xf32>
      %149 = arith.addf %144, %148 : vector<8x32xf32>
      %150 = arith.addf %149, %23 : vector<8x32xf32>
      %cst_60 = arith.constant dense<0.000000e+00> : vector<8xf32>
      %151 = vector.multi_reduction <add>, %150, %cst_60 [1] : vector<8x32xf32> to vector<8xf32>
      %152 = vector.shape_cast %151 : vector<8xf32> to vector<8x1xf32>
      %cst_61 = arith.constant 3.200000e+01 : f32
      %153 = vector.broadcast %cst_61 : f32 to vector<8x1xf32>
      %154 = arith.divf %152, %153 : vector<8x1xf32>
      %155 = vector.broadcast %154 : vector<8x1xf32> to vector<8x32xf32>
      %156 = arith.subf %150, %155 : vector<8x32xf32>
      %157 = arith.mulf %156, %156 : vector<8x32xf32>
      %cst_62 = arith.constant dense<0.000000e+00> : vector<8xf32>
      %158 = vector.multi_reduction <add>, %157, %cst_62 [1] : vector<8x32xf32> to vector<8xf32>
      %159 = vector.shape_cast %158 : vector<8xf32> to vector<8x1xf32>
      %cst_63 = arith.constant 3.200000e+01 : f32
      %160 = vector.broadcast %cst_63 : f32 to vector<8x1xf32>
      %161 = arith.divf %159, %160 : vector<8x1xf32>
      %162 = vector.broadcast %154 : vector<8x1xf32> to vector<8x32xf32>
      %163 = arith.subf %150, %162 : vector<8x32xf32>
      %cst_64 = arith.constant 9.99999997E-7 : f32
      %164 = vector.broadcast %cst_64 : f32 to vector<8x1xf32>
      %165 = arith.addf %161, %164 : vector<8x1xf32>
      %166 = math.rsqrt %165 : vector<8x1xf32>
      %167 = vector.broadcast %166 : vector<8x1xf32> to vector<8x32xf32>
      %168 = arith.mulf %163, %167 : vector<8x32xf32>
      %c0_65 = arith.constant 0 : index
      %c0_66 = arith.constant 0 : index
      %169 = vector.load %arg9[%c0_65, %c0_66] : memref<1x32xf32, #tpu.memory_space<vmem>>, vector<1x32xf32>
      %170 = vector.shape_cast %169 : vector<1x32xf32> to vector<32xf32>
      %171 = vector.shape_cast %170 : vector<32xf32> to vector<1x32xf32>
      %172 = vector.broadcast %171 : vector<1x32xf32> to vector<8x32xf32>
      %173 = arith.mulf %168, %172 : vector<8x32xf32>
      %c0_67 = arith.constant 0 : index
      %c0_68 = arith.constant 0 : index
      %174 = vector.load %arg10[%c0_67, %c0_68] : memref<1x32xf32, #tpu.memory_space<vmem>>, vector<1x32xf32>
      %175 = vector.shape_cast %174 : vector<1x32xf32> to vector<32xf32>
      %176 = vector.shape_cast %175 : vector<32xf32> to vector<1x32xf32>
      %177 = vector.broadcast %176 : vector<1x32xf32> to vector<8x32xf32>
      %178 = arith.addf %173, %177 : vector<8x32xf32>
      %179 = arith.truncf %178 : vector<8x32xf32> to vector<8x32xbf16>
      %c0_69 = arith.constant 0 : index
      %c0_70 = arith.constant 0 : index
      %180 = vector.load %arg16[%c0_69, %c0_70] : memref<8x32xbf16, #tpu.memory_space<vmem>>, vector<8x32xbf16>
      tpu.vector_store %arg16[%c0_69, %c0_70], %179 {strides = array<i32>} : memref<8x32xbf16, #tpu.memory_space<vmem>>, vector<8x32xbf16>,
      %c0_71 = arith.constant 0 : index
      %c0_72 = arith.constant 0 : index
      %181 = vector.load %arg14[%c0_71, %c0_72] : memref<1x32xf32, #tpu.memory_space<vmem>>, vector<1x32xf32>
      %182 = vector.shape_cast %181 : vector<1x32xf32> to vector<32xf32>
      %183 = vector.shape_cast %182 : vector<32xf32> to vector<1x32xf32>
      %184 = vector.broadcast %183 : vector<1x32xf32> to vector<8x32xf32>
      %185 = arith.addf %150, %184 : vector<8x32xf32>
      %c0_73 = arith.constant 0 : index
      %c0_74 = arith.constant 0 : index
      %186 = vector.load %arg17[%c0_73, %c0_74] : memref<8x32xf32, #tpu.memory_space<vmem>>, vector<8x32xf32>
      tpu.vector_store %arg17[%c0_73, %c0_74], %185 {strides = array<i32>} : memref<8x32xf32, #tpu.memory_space<vmem>>, vector<8x32xf32>,
    } else {
    }
    %c0 = arith.constant 0 : index
    %c0_1 = arith.constant 0 : index
    %3 = vector.load %arg16[%c0, %c0_1] : memref<8x32xbf16, #tpu.memory_space<vmem>>, vector<8x32xbf16>
    %c0_2 = arith.constant 0 : index
    %c0_3 = arith.constant 0 : index
    %4 = vector.load %arg11[%c0_2, %c0_3] : memref<32x512xbf16, #tpu.memory_space<vmem>>, vector<32x512xbf16>
    %cst = arith.constant dense<0.000000e+00> : vector<8x512xf32>
    %5 = tpu.matmul %3, %4, %cst {dimension_numbers = #tpu.dot_dimension_numbers<[1], [0], [0], [1], [0, 0, 1, 1], [], []>} : vector<8x32xbf16>, vector<32x512xbf16>, vector<8x512xf32> -> vector<8x512xf32>
    %c0_4 = arith.constant 0 : index
    %c0_5 = arith.constant 0 : index
    %6 = vector.load %arg12[%c0_4, %c0_5] : memref<1x512xf32, #tpu.memory_space<vmem>>, vector<1x512xf32>
    %7 = vector.shape_cast %6 : vector<1x512xf32> to vector<512xf32>
    %8 = vector.shape_cast %7 : vector<512xf32> to vector<1x512xf32>
    %9 = vector.broadcast %8 : vector<1x512xf32> to vector<8x512xf32>
    %10 = arith.addf %5, %9 : vector<8x512xf32>
    %cst_6 = arith.constant 0.000000e+00 : f32
    %11 = vector.broadcast %cst_6 : f32 to vector<8x512xf32>
    %12 = arith.maximumf %10, %11 : vector<8x512xf32>
    %c0_7 = arith.constant 0 : index
    %c0_8 = arith.constant 0 : index
    %13 = vector.load %arg17[%c0_7, %c0_8] : memref<8x32xf32, #tpu.memory_space<vmem>>, vector<8x32xf32>
    %14 = arith.truncf %12 : vector<8x512xf32> to vector<8x512xbf16>
    %c0_9 = arith.constant 0 : index
    %c0_10 = arith.constant 0 : index
    %15 = vector.load %arg13[%c0_9, %c0_10] : memref<512x32xbf16, #tpu.memory_space<vmem>>, vector<512x32xbf16>
    %cst_11 = arith.constant dense<0.000000e+00> : vector<8x32xf32>
    %16 = tpu.matmul %14, %15, %cst_11 {dimension_numbers = #tpu.dot_dimension_numbers<[1], [0], [0], [1], [0, 0, 1, 1], [], []>} : vector<8x512xbf16>, vector<512x32xbf16>, vector<8x32xf32> -> vector<8x32xf32>
    %17 = arith.addf %13, %16 : vector<8x32xf32>
    %c0_12 = arith.constant 0 : index
    %c0_13 = arith.constant 0 : index
    %18 = vector.load %arg17[%c0_12, %c0_13] : memref<8x32xf32, #tpu.memory_space<vmem>>, vector<8x32xf32>
    tpu.vector_store %arg17[%c0_12, %c0_13], %17 {strides = array<i32>} : memref<8x32xf32, #tpu.memory_space<vmem>>, vector<8x32xf32>,
    %c3_i32 = arith.constant 3 : i32
    %19 = arith.cmpi eq, %arg1, %c3_i32 : i32
    %20 = arith.extui %19 : i1 to i32
    %c0_i32_14 = arith.constant 0 : i32
    %21 = arith.cmpi ne, %20, %c0_i32_14 : i32
    scf.if %21 {
      %c0_15 = arith.constant 0 : index
      %c0_16 = arith.constant 0 : index
      %22 = vector.load %arg17[%c0_15, %c0_16] : memref<8x32xf32, #tpu.memory_space<vmem>>, vector<8x32xf32>
      %c0_17 = arith.constant 0 : index
      %c0_18 = arith.constant 0 : index
      %c0_19 = arith.constant 0 : index
      %23 = vector.load %arg15[%c0_17, %c0_18, %c0_19] : memref<1x8x32xf32, #tpu.memory_space<vmem>>, vector<1x8x32xf32>
      %24 = vector.shape_cast %23 : vector<1x8x32xf32> to vector<8x32xf32>
      %25 = vector.shape_cast %22 : vector<8x32xf32> to vector<1x8x32xf32>
      tpu.vector_store %arg15[%c0_17, %c0_18, %c0_19], %25 {strides = array<i32>} : memref<1x8x32xf32, #tpu.memory_space<vmem>>, vector<1x8x32xf32>,
    } else {
    }
    return
  }
  func.func @transform_0(%arg0: i32, %arg1: i32) -> (i32, i32, i32) {
    %c0_i32 = arith.constant 0 : i32
    %c0_i32_0 = arith.constant 0 : i32
    %c0_i32_1 = arith.constant 0 : i32
    return %arg0, %c0_i32, %c0_i32_0 : i32, i32, i32
  }
  func.func @transform_1(%arg0: i32, %arg1: i32) -> (i32, i32) {
    %c0_i32 = arith.constant 0 : i32
    %c0_i32_0 = arith.constant 0 : i32
    %c0_i32_1 = arith.constant 0 : i32
    return %c0_i32, %c0_i32_0 : i32, i32
  }
  func.func @transform_2(%arg0: i32, %arg1: i32) -> (i32, i32) {
    %c0_i32 = arith.constant 0 : i32
    %c0_i32_0 = arith.constant 0 : i32
    %c0_i32_1 = arith.constant 0 : i32
    return %c0_i32, %c0_i32_0 : i32, i32
  }
  func.func @transform_3(%arg0: i32, %arg1: i32) -> (i32, i32) {
    %c0_i32 = arith.constant 0 : i32
    %c0_i32_0 = arith.constant 0 : i32
    %c0_i32_1 = arith.constant 0 : i32
    return %c0_i32, %c0_i32_0 : i32, i32
  }
  func.func @transform_4(%arg0: i32, %arg1: i32) -> (i32, i32) {
    %c0_i32 = arith.constant 0 : i32
    %c0_i32_0 = arith.constant 0 : i32
    %c0_i32_1 = arith.constant 0 : i32
    return %c0_i32, %c0_i32_0 : i32, i32
  }
  func.func @transform_5(%arg0: i32, %arg1: i32) -> (i32, i32) {
    %c0_i32 = arith.constant 0 : i32
    %c0_i32_0 = arith.constant 0 : i32
    %c0_i32_1 = arith.constant 0 : i32
    return %c0_i32, %c0_i32_0 : i32, i32
  }
  func.func @transform_6(%arg0: i32, %arg1: i32) -> (i32, i32) {
    %c0_i32 = arith.constant 0 : i32
    %c0_i32_0 = arith.constant 0 : i32
    %c0_i32_1 = arith.constant 0 : i32
    return %c0_i32, %c0_i32_0 : i32, i32
  }
  func.func @transform_7(%arg0: i32, %arg1: i32) -> (i32, i32) {
    %c0_i32 = arith.constant 0 : i32
    %c0_i32_0 = arith.constant 0 : i32
    %c0_i32_1 = arith.constant 0 : i32
    return %c0_i32, %c0_i32_0 : i32, i32
  }
  func.func @transform_8(%arg0: i32, %arg1: i32) -> (i32, i32) {
    %c0_i32 = arith.constant 0 : i32
    %c0_i32_0 = arith.constant 0 : i32
    %c0_i32_1 = arith.constant 0 : i32
    return %c0_i32, %c0_i32_0 : i32, i32
  }
  func.func @transform_9(%arg0: i32, %arg1: i32) -> (i32, i32) {
    %c0_i32 = arith.constant 0 : i32
    %c0_i32_0 = arith.constant 0 : i32
    return %c0_i32, %arg1 : i32, i32
  }
  func.func @transform_10(%arg0: i32, %arg1: i32) -> (i32, i32) {
    %c0_i32 = arith.constant 0 : i32
    %c0_i32_0 = arith.constant 0 : i32
    return %c0_i32, %arg1 : i32, i32
  }
  func.func @transform_11(%arg0: i32, %arg1: i32) -> (i32, i32) {
    %c0_i32 = arith.constant 0 : i32
    %c0_i32_0 = arith.constant 0 : i32
    return %arg1, %c0_i32 : i32, i32
  }
  func.func @transform_12(%arg0: i32, %arg1: i32) -> (i32, i32) {
    %c0_i32 = arith.constant 0 : i32
    %c0_i32_0 = arith.constant 0 : i32
    %c0_i32_1 = arith.constant 0 : i32
    return %c0_i32, %c0_i32_0 : i32, i32
  }
  func.func @transform_13(%arg0: i32, %arg1: i32) -> (i32, i32, i32) {
    %c0_i32 = arith.constant 0 : i32
    %c0_i32_0 = arith.constant 0 : i32
    %c0_i32_1 = arith.constant 0 : i32
    return %arg0, %c0_i32, %c0_i32_0 : i32, i32, i32
  }
}

</mosaic_0001>

<bundles_post_ra>
// kernel: tpu_custom_call.1
= control target key start
LH: loop header
LB: loop body
LE: loop exit
PB: predicated region body
PF: predicated region fallthrough
CT: control target
= control target key end

     0   :  { %s2947_s0 = inlined_call_operand.vmem [shape: f32[2,8,32], index: 0, kind: input, shape index: {}]   ;;  %s2948_s1 = inlined_call_operand.vmem [shape: f32[1,32], index: 1, kind: input, shape index: {}]   ;;  %s2949_s2 = inlined_call_operand.vmem [shape: f32[1,32], index: 2, kind: input, shape index: {}]   ;;  %s2950_s3 = inlined_call_operand.vmem [shape: bf16[32,96], index: 3, kind: input, shape index: {}]   ;;  %s2951_s4 = inlined_call_operand.vmem [shape: f32[1,96], index: 4, kind: input, shape index: {}]   ;;  %s2952_s5 = inlined_call_operand.vmem [shape: bf16[32,32], index: 5, kind: input, shape index: {}]   ;;  %s2953_s6 = inlined_call_operand.vmem [shape: f32[1,32], index: 6, kind: input, shape index: {}]   ;;  %s2954_s7 = inlined_call_operand.vmem [shape: f32[1,32], index: 7, kind: input, shape index: {}]   ;;  %s2955_s8 = inlined_call_operand.vmem [shape: f32[1,32], index: 8, kind: input, shape index: {}]   ;;  %s2956_s9 = inlined_call_operand.vmem [shape: bf16[32,2048], index: 9, kind: input, shape index: {}]   ;;  %s2957_s10 = inlined_call_operand.vmem [shape: f32[1,2048], index: 10, kind: input, shape index: {}]   ;;  %s2958_s11 = inlined_call_operand.vmem [shape: bf16[2048,32], index: 11, kind: input, shape index: {}]   ;;  %s2959_s12 = inlined_call_operand.vmem [shape: f32[1,32], index: 12, kind: input, shape index: {}]   ;;  %s2960_s13 = inlined_call_operand.hbm [shape: f32[2,8,32], index: 13, kind: output, shape index: {}]  }
   0x1   :  { %2973 = sst [smem:[#allocation19_spill]] %s2954_s7 }
   0x2   :  { %2974 = sst [smem:[#allocation20_spill]] %s2955_s8 }
   0x3   :  { %2975 = sst [smem:[#allocation21_spill]] %s2956_s9 }
   0x4   :  { %2976 = sst [smem:[#allocation22_spill]] %s2959_s12 }
   0x5   :  { %2977 = sst [smem:[#allocation23_spill]] %s2960_s13 }
   0x6   :  { %18 = vsyncpa [#allocation6], 0 }
   0x7   :  { %20 = vsyncpa [#allocation6 + $0x1], 0  ;;  %s2567_s25 = smov 0   ;;  %s2569_s26 = smov 0  }
   0x8   :  { %s2571_s27 = smov 0   ;;  %s2573_s28 = smov 0  }
   0x9   :  { %s2575_s29 = smov 0   ;;  %s2577_s30 = smov 0  }
   0xa   :  { %s2579_s14 = smov 0   ;;  %s2581_s15 = smov 0  }
   0xb   :  { %s2583_s16 = smov 0   ;;  %s2585_s17 = smov 0  }
   0xc LB: > { %2978 = sst [smem:[#allocation8_spill]] %s2444_s25  ;;  %s1967_s18 = sadd.s32 4294967295, %s2480_s17   ;;  %s2480_s17 = sphi %s2585_s17, %s26_s17   ;;  %s2476_s16 = sphi %s2583_s16, %s3008_s16   ;;  %s2472_s15 = sphi %s2581_s15, %s3007_s15   ;;  %s2468_s14 = sphi %s2579_s14, %s3006_s14   ;;  %s2464_s30 = sphi %s2577_s30, %s3011_s30   ;;  %s2460_s29 = sphi %s2575_s29, %s3004_s29   ;;  %s2456_s28 = sphi %s2573_s28, %s3003_s28   ;;  %s2452_s27 = sphi %s2571_s27, %s3002_s27   ;;  %s2448_s26 = sphi %s2569_s26, %s3010_s26   ;;  %s2444_s25 = sphi %s2567_s25, %s3009_s25  }
   0xd   : > { %2979 = sst [smem:[#allocation9_spill]] %s2452_s27  ;;  %s1968_s19 = sadd.s32 4294967294, %s2480_s17  }
   0xe   : > { %2980 = sst [smem:[#allocation10_spill]] %s2460_s29  ;;  %s35_s20 = sadd.s32 1, %s2472_s15 }
   0xf   : > { %2981 = sst [smem:[#allocation11_spill]] %s2472_s15  ;;  %s38_s21 = sadd.s32 1, %s2476_s16 }
  0x10   : > { %2982 = sst [smem:[#allocation12_spill]] %s2476_s16  ;;  %p36_p0 = scmp.ge.s32.totalorder %s35_s20, 4 }
  0x11   : > { %2983 = sst [smem:[#allocation13_spill]] %s2480_s17  ;;  %s239_s22 = sadd.s32 1, %s2460_s29 }
  0x12   : > { %p246_p1 = scmp.ne.s32.totalorder %s2460_s29, %s2456_s28  ;;  %p247_p2 = scmp.eq.s32.totalorder %s2480_s17, 0 }
  0x13   : > { %s3013_s20 = smov (%p36_p0, %s35_s20), 0  ;;  %s3015_s21 = smov (!%p36_p0, %s38_s21), %s2476_s16 }
  0x14   : > { %2984 = sst [smem:[#allocation14_spill]] %s3013_s20  ;;  %s236_s23 = ssub.s32 %s2472_s15, %s3013_s20 }
  0x15   : > { %p2630_p3 = por %p247_p2, %p246_p1  ;;  %p40_p4 = scmp.ge.s32.totalorder %s3015_s21, 2 }
  0x16   : > { %p237_p5 = scmp.eq.s32.totalorder %s236_s23, 0  ;;  %s338_s13 = sadd.s32 1, %s2452_s27 }
  0x17   : > { %p348_p6 = scmp.ne.s32.totalorder %s2452_s27, %s2448_s26  ;;  %s3017_s21 = smov (%p40_p4, %s3015_s21), 0 }
  0x18   : > { %2986 = sst [smem:[#allocation15_spill]] %s3017_s21  ;;  %s335_s7 = ssub.s32 %s2476_s16, %s3017_s21 }
  0x19   : > { %s2640_s8 = scalar_select %p237_p5, %s2460_s29, %s239_s22  }
  0x1a   : > { %p349_p7 = scmp.eq.s32.totalorder %s1967_s18, 7  ;;  %p336_p8 = scmp.eq.s32.totalorder %s335_s7, 0 }
  0x1b   : > { %2987 = sst [smem:[#allocation16_spill]] %s2640_s8  ;;  %p354_p9 = scmp.ne.s32.totalorder %s2448_s26, %s2444_s25 }
  0x1c   : > { %p2646_p10 = por %p349_p7, %p348_p6  ;;  %p355_p11 = scmp.eq.s32.totalorder %s1968_s19, 7 }
  0x1d   : > { %s2651_s20 = scalar_select %p336_p8, %s2452_s27, %s338_s13  }
  0x1e   : > { %p2653_p12 = por %p355_p11, %p354_p9  ;;  %p1970_p13 = scmp.ge.s32.totalorder %s2480_s17, 8 }
  0x1f   : > { %2989 = sst [smem:[#allocation17_spill]] %s2651_s20 }
  0x20   : > { %s2990_s23 = scalar_select %p2653_p12, 1, 0 }
  0x21   : > { %398 = sbr.rel (%p1970_p13) target bundleno = 54 (0x36), region = 52 }
  0x22   : > { %2991 = sst [smem:[#allocation18_spill]] %s2990_s23 }
  0x28   : > { %408 = sbr.rel (!%p2630_p3) target bundleno = 54 (0x36), region = 60  ;;  %s410_s7 = sand.u32 (%p2630_p3), 1, %s2460_s29  }
  0x29   : > { %s2051_s18 = sshll.u32 (%p2630_p3), %s2472_s15, 4  ;;  %s1971_s22 = sshll.u32 (%p2630_p3), %s410_s7, 6 }
  0x2a   : > { %s2992_s9 = sld [smem:[#allocation21_spill]] (%p2630_p3)  ;;  %s412_s19 = scalar_lea.vmem (%p2630_p3), [#allocation4], %s1971_s22 }
  0x30   : > { %s415_s13 = scalar_lea.vmem %s2992_s9, %s2051_s18 }
  0x31   : > { %v428_v0 = vld [vmem:[%s415_s13] sm:$0xff]  ;;  %v430_v1 = vld [vmem:[%s415_s13 + $0x8] sm:$0xff] }
  0x32   : > { %v432_v2 = vld [vmem:[%s415_s13 + $0x40] sm:$0xff]  ;;  %429 = vst [vmem:[%s412_s19] sm:$0xff] %v428_v0  ;;  %431 = vst [vmem:[%s412_s19 + $0x8] sm:$0xff] %v430_v1  ;;  %v434_v3 = vld [vmem:[%s415_s13 + $0x48] sm:$0xff] }
  0x33   : > { %433 = vst [vmem:[%s412_s19 + $0x10] sm:$0xff] %v432_v2  ;;  %v436_v4 = vld [vmem:[%s415_s13 + $0x80] sm:$0xff]  ;;  %v438_v5 = vld [vmem:[%s415_s13 + $0x88] sm:$0xff]  ;;  %435 = vst [vmem:[%s412_s19 + $0x18] sm:$0xff] %v434_v3 }
  0x34   : > { %437 = vst [vmem:[%s412_s19 + $0x20] sm:$0xff] %v436_v4  ;;  %439 = vst [vmem:[%s412_s19 + $0x28] sm:$0xff] %v438_v5  ;;  %v440_v6 = vld [vmem:[%s415_s13 + $0xc0] sm:$0xff]  ;;  %v442_v7 = vld [vmem:[%s415_s13 + $0xc8] sm:$0xff] }
  0x35   : > { %441 = vst [vmem:[%s412_s19 + $0x30] sm:$0xff] %v440_v6  ;;  %443 = vst [vmem:[%s412_s19 + $0x38] sm:$0xff] %v442_v7 }
  0x36 PF: > { %p1974_p0 = scmp.ge.s32.totalorder %s2480_s17, 1  ;;  %p465_p1 = scmp.lt.s32.totalorder %s2480_s17, 9 }
  0x38   : > { %p466_p2 = pnand %p1974_p0, %p465_p1 }
  0x39   : > { %s472_s16 = sand.u32 (!%p466_p2), 1, %s2456_s28   ;;  %s2966_s21 = sand.u32 (!%p466_p2), 1, %s2448_s26  }
  0x3a   : > { %469 = sbr.rel (%p466_p2) target bundleno = 3779 (0xec3), region = 91  ;;  %s1975_s24 = sshll.u32 (!%p466_p2), %s472_s16, 6 }
  0x3b   : > { %s2671_s7 = sshll.u32 (!%p466_p2), %s2966_s21, 3  ;;  %p528_p3 = scmp.lt.s32.totalorder (!%p466_p2), %s2468_s14, 1 }
  0x3c   : > { %s1978_s18 = sshll.u32 (!%p466_p2), %s2464_s30, 2  ;;  %s1979_s22 = sshll.u32 (!%p466_p2), %s2464_s30, 6 }
  0x3d   : > { %p534_p4 = scmp.lt.s32.totalorder (!%p466_p2), %s1978_s18, 15  ;;  %p539_p5 = scmp.lt.s32.totalorder (!%p466_p2), %s1979_s22, 255 }
  0x3e   : > { %s2691_s25 = scalar_lea.vmem (!%p466_p2), [#allocation4], %s1975_s24  ;;  %s527_s17 = scalar_lea.vmem (!%p466_p2), [#allocation5], %s2671_s7 }
  0x3f   : > { %p1981_p6 = scmp.ne.s32.totalorder (!%p466_p2), %s2464_s30, 0 }
  0x41   : > { %s529_s13 = scalar_select %p528_p3, %s2468_s14, 1 }
  0x42   : > { %s3019_s18 = smov (!%p534_p4, %s1978_s18), 15  ;;  %s3021_s22 = smov (!%p539_p5, %s1979_s22), 255 }
  0x43   : > { %s1977_s19 = sshll.u32 %s529_s13, 3  ;;  %s536_s21 = scalar_lea.vmem %s2957_s10, %s3019_s18  ;;  %vm550_vm0 = vcmask (!%p1981_p6), 261120   ;;  %v2304_v15 = vld [vmem:[%s2950_s3] sm:$0xff] (!%p1981_p6)   ;;  %v2482_v16 = vmov (!%p1981_p6), 0.0   ;;  %vm2483_vm1 = vmmov (!%p1981_p6), 0   ;;  %v2305_v17 = vld [vmem:[%s2950_s3 + $0x8] sm:$0xff] (!%p1981_p6)  }
  0x44   : > { %s531_s28 = scalar_lea.vmem %s2947_s0, %s1977_s19  ;;  %s1980_s29 = sshll.u32 %s3021_s22, 2  ;;  %2123 = vmatprep.subr.bf16.mxu0 (!%p1981_p6), %v2482_v16  ;;  %2127 = vmatprep.mubr.msk.bf16.mxu0 (!%p1981_p6), %vm2483_vm1, %v2482_v16  ;;  %v1982_v22 = vld [vmem:[%s2948_s1] ss:$0 sm:$0xff] (!%p1981_p6)  ;;  %vm652_vm2 = vcmask (!%p1981_p6), 64512   ;;  %vm716_vm3 = vcmask (!%p1981_p6), 1043456   ;;  %vm1323_vm4 = vcmask (!%p1981_p6), 257024  }
  0x45   : > { %s2689_s23 = scalar_lea.vmem %s2958_s11, %s1980_s29  ;;  %548 = sbr.rel (%p1981_p6) target bundleno = 3295 (0xcdf), region = 99  ;;  %v2695_v8 = vld [vmem:[%s531_s28] sm:$0xff] (!%p1981_p6)  ;;  %2124 = vmatpush3.bf16.msra.mxu0 (!%p1981_p6), %v2304_v15  ;;  %2131 = vmatprep.subr.bf16.mxu1 (!%p1981_p6), %v2482_v16 }
  0x46   : > { %v551_v9 = vsel (!%p1981_p6), %vm550_vm0, %v2695_v8, 0.0  ;;  %2125 = vmatprep.subr.bf16.mxu0 (!%p1981_p6), %v2482_v16  ;;  %2133 = vmatprep.mubr.msk.bf16.mxu1 (!%p1981_p6), %vm2483_vm1, %v2482_v16  ;;  %v1983_v24 = vld [vmem:[%s2949_s2] ss:$0 sm:$0xff] (!%p1981_p6)  ;;  %s2484_s28 = smov (!%p1981_p6), 120   ;;  %s2485_s16 = smov (!%p1981_p6), 96  }
  0x47   : > { %552 = vadd.xlane.f32.xlu0 (!%p1981_p6), %v551_v9  ;;  %v1984_v28 = vld [vmem:[%s2951_s4] ss:$0 sm:$0xff] (!%p1981_p6)  ;;  %s2486_s8 = smov (!%p1981_p6), 88   ;;  %s2487_s9 = smov (!%p1981_p6), 56  }
  0x48   : > { %s2488_s27 = smov (!%p1981_p6), 64   ;;  %s2489_s29 = smov (!%p1981_p6), 80   ;;  %v761_v9 = vld [vmem:[%s2952_s5] sm:$0xf] (!%p1981_p6) }
  0x49   : > { %2126 = vmatpush3.bf16.msra.mxu0 (!%p1981_p6), %v2305_v17  ;;  %s2490_s15 = smov (!%p1981_p6), 112   ;;  %s2491_s19 = smov (!%p1981_p6), 48  }
  0x4a   : > { %2137 = vmatprep.subr.bf16.mxu0 (!%p1981_p6), %v2482_v16 }
  0xd4   : > { %v553_v10 = vpop.xlane.xlu0 %552 }
  0xd5   : > { %v555_v11 = vmul.f32 0.03125, %v553_v10  ;;  %v924_v10 = vsel %vm716_vm3, %v761_v9, 0 }
  0xd7   : > { %v556_v12 = vsub.f32 %v2695_v8, %v555_v11  ;;  %v873_v11 = vld [vmem:[%s2952_s5 + $0x4] sm:$0xf] }
  0xd9   : > { %v557_v13 = vmul.f32 %v556_v12, %v556_v12 }
  0xdb   : > { %v558_v14 = vsel %vm550_vm0, %v557_v13, 0.0 }
  0xdc   : > { %559 = vadd.xlane.f32.xlu0 %v558_v14 }
 0x169   : > { %v560_v18 = vpop.xlane.xlu0 %559 }
 0x16a   : > { %v561_v19 = vmul.f32 0.03125, %v560_v18 }
 0x16c   : > { %v562_v20 = vadd.f32 1e-06, %v561_v19 }
 0x16e   : > { %2306 = vrsqrt.f32 %v562_v20 }
 0x178   : > { %v2307_v21 = vpop.eup %2306 }
 0x179   : > { %v564_v23 = vmul.f32 %v2307_v21, %v556_v12  ;;  %v878_v12 = vsel %vm716_vm3, %v873_v11, 0 }
 0x17b   : > { %v572_v25 = vmul.f32 %v1982_v22, %v564_v23 }
 0x17d   : > { %v580_v26 = vadd.f32 %v1983_v24, %v572_v25 }
 0x17f   : > { %v581_v27 = vpack.c.bf16 %v580_v26, %v580_v26 }
 0x181   : > { %2128 = vmatmul.mubr.msk.bf16.vlgmr.msra.gmra.mrb[0].mxu0 %vm550_vm0, %v581_v27 }
 0x182   : > { %2139 = vmatprep.mubr.msk.bf16.mxu0 %vm2483_vm1, %v2482_v16 }
 0x254   : > { %v642_v29 = vpop.f32.mrb[0].mxu0 }
 0x255   : > { %v643_v30 = vadd.f32 %v1984_v28, %v642_v29  ;;  %v2129_v31 = vpop.f32.mrb[1].mxu0 }
 0x256   : > { %v645_v32 = vpop.f32.mrb[2].mxu0 }
 0x257   : > { %v2727_v33 = vpack.c.bf16 %v643_v30, %v643_v30  ;;  %v2130_v34 = vpop.f32.mrb[3].mxu0 }
 0x259   : > { %762 = vrot.lane.b32.xlu0 %v2727_v33, %s2484_s28  ;;  %650 = vrot.lane.b32.xlu1 %v2727_v33, %s2485_s16  ;;  %s2492_s28 = smov 104   ;;  %s2493_s16 = smov 72  }
 0x25d   : > { %764 = vrot.lane.b32.xlu1 %v2727_v33, %s2486_s8  ;;  %s2994_s8 = sld [smem:[#allocation19_spill]] }
 0x2cb   : > { %v651_v35 = vpop.permute.xlu1 %650  ;;  %v763_v39 = vpop.permute.xlu0 %762 }
 0x2cc   : > { %v657_v36 = vsel %vm652_vm2, %v651_v35, 0 }
 0x2cd   : > { %2132 = vmatpush3.bf16.xpose.msra.mxu1 %v657_v36 }
 0x2ce   : > { %2143 = vmatprep.subr.bf16.mxu1 %v2482_v16 }
 0x2cf   : > { %v765_v37 = vpop.permute.xlu1 %764 }
 0x2d0   : > { %v770_v38 = vsel %vm652_vm2, %v765_v37, 0 }
 0x2d4   : > { %2134 = vmatmul.mubr.msk.bf16.vlgmr.msra.gmra.mrb[0].mxu1 %vm652_vm2, %v2727_v33 }
 0x2d5   : > { %2144 = vmatpush3.bf16.xpose.msra.mxu1 %v770_v38  ;;  %2145 = vmatprep.mubr.msk.bf16.mxu1 %vm2483_vm1, %v2482_v16 }
 0x2d6   : > { %2155 = vmatprep.subr.bf16.mxu1 %v2482_v16 }
 0x2dc   : > { %2146 = vmatmul.mubr.msk.bf16.vlgmr.msra.gmra.mrb[4].mxu1 %vm652_vm2, %v763_v39 }
 0x2dd   : > { %2157 = vmatprep.mubr.msk.bf16.mxu1 %vm2483_vm1, %v2482_v16  ;;  %2156 = vmatpush3.bf16.msra.mxu1 %v878_v12 }
 0x2de   : > { %2167 = vmatprep.subr.bf16.mxu1 %v2482_v16 }
 0x3a7   : > { %v693_v40 = vpop.f32.mrb[0].mxu1 }
 0x3a8   : > { %v2135_v41 = vpop.f32.mrb[1].mxu1  ;;  %v699_v42 = vsel %vm652_vm2, %v693_v40, -inf }
 0x3a9   : > { %700 = vmax.xlane.f32.xlu1 %v699_v42  ;;  %v696_v43 = vpop.f32.mrb[2].mxu1 }
 0x3aa   : > { %v2136_v44 = vpop.f32.mrb[3].mxu1 }
 0x3af   : > { %v806_v45 = vpop.f32.mrb[4].mxu1 }
 0x3b0   : > { %v2147_v46 = vpop.f32.mrb[5].mxu1  ;;  %v812_v47 = vsel %vm652_vm2, %v806_v45, -inf }
 0x3b1   : > { %813 = vmax.xlane.f32.xlu0 %v812_v47  ;;  %v809_v48 = vpop.f32.mrb[6].mxu1 }
 0x3b2   : > { %v2148_v49 = vpop.f32.mrb[7].mxu1 }
 0x3c7   : > { %824 = vrot.lane.b32.xlu0 %v2727_v33, %s2487_s9 }
 0x436   : > { %v701_v50 = vpop.xlane.xlu1 %700 }
 0x437   : > { %v702_v51 = vsub.f32 %v693_v40, %v701_v50 }
 0x439   : > { %v703_v52 = vmul.f32 1.442695, %v702_v51 }
 0x43b   : > { %2308 = vpow2.f32 %v703_v52 }
 0x43e   : > { %v814_v53 = vpop.xlane.xlu0 %813 }
 0x43f   : > { %v815_v54 = vsub.f32 %v806_v45, %v814_v53 }
 0x441   : > { %v816_v55 = vmul.f32 1.442695, %v815_v54 }
 0x442   : > { %v825_v2 = vpop.permute.xlu0 %824 }
 0x443   : > { %2310 = vpow2.f32 %v816_v55  ;;  %v830_v4 = vsel %vm716_vm3, %v825_v2, 0 }
 0x445   : > { %v2309_v56 = vpop.eup %2308 }
 0x446   : > { %v705_v57 = vsel %vm652_vm2, %v2309_v56, 0.0 }
 0x447   : > { %706 = vadd.xlane.f32.xlu1 %v705_v57 }
 0x44d   : > { %v2311_v58 = vpop.eup %2310 }
 0x44e   : > { %v818_v59 = vsel %vm652_vm2, %v2311_v58, 0.0 }
 0x44f   : > { %819 = vadd.xlane.f32.xlu1 %v818_v59 }
 0x460   : > { %711 = vrot.lane.b32.xlu1 %v2727_v33, %s2488_s27  ;;  %s2494_s27 = smov 40  }
 0x464   : > { %968 = vrot.lane.b32.xlu1 %v2727_v33, %s2489_s29  ;;  %s2995_s29 = sld [smem:[#allocation20_spill]] }
 0x468   : > { %966 = vrot.lane.b32.xlu1 %v2727_v33, %s2490_s15 }
 0x4d4   : > { %v707_v60 = vpop.xlane.xlu1 %706 }
 0x4d5   : > { %2312 = vrcp.f32 %v707_v60 }
 0x4dc   : > { %v820_v61 = vpop.xlane.xlu1 %819 }
 0x4dd   : > { %2314 = vrcp.f32 %v820_v61 }
 0x4df   : > { %v2313_v62 = vpop.eup %2312 }
 0x4e0   : > { %v709_v63 = vmul.f32 %v2313_v62, %v2309_v56  ;;  %v712_v0 = vpop.permute.xlu1 %711  ;;  %v1077_v56 = vld [vmem:[%s2952_s5 + $0x8] sm:$0xf] }
 0x4e1   : > { %v718_v1 = vsel %vm716_vm3, %v712_v0, 0  ;;  %v1082_v57 = vsel %vm716_vm3, %v1077_v56, 0 }
 0x4e2   : > { %2138 = vmatpush3.bf16.msra.mxu0 %v718_v1  ;;  %v710_v3 = vpack.c.bf16 %v709_v63, %v709_v63 }
 0x4e3   : > { %2149 = vmatprep.subr.bf16.mxu0 %v2482_v16 }
 0x4e4   : > { %v969_v19 = vpop.permute.xlu1 %968 }
 0x4e5   : > { %2140 = vmatmul.mubr.msk.bf16.vlgmr.msra.gmra.mrb[4].mxu0 %vm652_vm2, %v710_v3  ;;  %v974_v24 = vsel %vm652_vm2, %v969_v19, 0 }
 0x4e6   : > { %2150 = vmatpush3.bf16.msra.mxu0 %v830_v4  ;;  %2151 = vmatprep.mubr.msk.bf16.mxu0 %vm2483_vm1, %v2482_v16 }
 0x4e7   : > { %v2315_v5 = vpop.eup %2314  ;;  %2161 = vmatprep.subr.bf16.mxu0 %v2482_v16 }
 0x4e8   : > { %v822_v6 = vmul.f32 %v2315_v5, %v2311_v58  ;;  %v967_v26 = vpop.permute.xlu1 %966 }
 0x4ea   : > { %v823_v7 = vpack.c.bf16 %v822_v6, %v822_v6 }
 0x4ed   : > { %2152 = vmatmul.mubr.msk.bf16.vlgmr.msra.gmra.mrb[8].mxu0 %vm652_vm2, %v823_v7 }
 0x4ee   : > { %2163 = vmatprep.mubr.msk.bf16.mxu0 %vm2483_vm1, %v2482_v16  ;;  %2162 = vmatpush3.bf16.msra.mxu0 %v924_v10 }
 0x4ef   : > { %2173 = vmatprep.subr.bf16.mxu0 %v2482_v16 }
 0x5b8   : > { %v754_v13 = vpop.f32.mrb[4].mxu0 }
 0x5b9   : > { %v760_v14 = vpack.c.bf16 %v754_v13, %v754_v13  ;;  %v2141_v15 = vpop.f32.mrb[5].mxu0 }
 0x5ba   : > { %v757_v17 = vpop.f32.mrb[6].mxu0 }
 0x5bb   : > { %v2142_v18 = vpop.f32.mrb[7].mxu0  ;;  %2164 = vmatmul.mubr.msk.bf16.vlgmr.msra.gmra.mrb[12].mxu0 %vm652_vm2, %v760_v14 }
 0x5bc   : > { %2175 = vmatprep.mubr.msk.bf16.mxu0 %vm2483_vm1, %v2482_v16 }
 0x5c0   : > { %v866_v20 = vpop.f32.mrb[8].mxu0 }
 0x5c1   : > { %v872_v21 = vpack.c.bf16 %v866_v20, %v866_v20  ;;  %v2153_v22 = vpop.f32.mrb[9].mxu0 }
 0x5c2   : > { %v869_v23 = vpop.f32.mrb[10].mxu0 }
 0x5c3   : > { %v2154_v25 = vpop.f32.mrb[11].mxu0  ;;  %2158 = vmatmul.mubr.msk.bf16.vlgmr.msra.gmra.mrb[8].mxu1 %vm652_vm2, %v872_v21 }
 0x5c4   : > { %2168 = vmatpush3.bf16.xpose.msra.mxu1 %v974_v24  ;;  %2169 = vmatprep.mubr.msk.bf16.mxu1 %vm2483_vm1, %v2482_v16 }
 0x5c5   : > { %2179 = vmatprep.subr.bf16.mxu1 %v2482_v16 }
 0x5cb   : > { %2170 = vmatmul.mubr.msk.bf16.vlgmr.msra.gmra.mrb[12].mxu1 %vm652_vm2, %v967_v26 }
 0x5cc   : > { %2181 = vmatprep.mubr.msk.bf16.mxu1 %vm2483_vm1, %v2482_v16  ;;  %2180 = vmatpush3.bf16.msra.mxu1 %v1082_v57 }
 0x5cd   : > { %2191 = vmatprep.subr.bf16.mxu1 %v2482_v16 }
 0x68e   : > { %v960_v27 = vpop.f32.mrb[12].mxu0 }
 0x68f   : > { %v2165_v28 = vpop.f32.mrb[13].mxu0 }
 0x690   : > { %v963_v29 = vpop.f32.mrb[14].mxu0  ;;  %v2000_v28 = vld [vmem:[%s2953_s6] ss:$0 sm:$0xff] }
 0x691   : > { %v2166_v30 = vpop.f32.mrb[15].mxu0 }
 0x696   : > { %v914_v31 = vpop.f32.mrb[8].mxu1 }
 0x697   : > { %v2782_v32 = vadd.f32 %v960_v27, %v914_v31  ;;  %v2159_v34 = vpop.f32.mrb[9].mxu1 }
 0x698   : > { %v917_v35 = vpop.f32.mrb[10].mxu1 }
 0x699   : > { %v2160_v36 = vpop.f32.mrb[11].mxu1 }
 0x69e   : > { %v1010_v37 = vpop.f32.mrb[12].mxu1 }
 0x69f   : > { %v2171_v38 = vpop.f32.mrb[13].mxu1  ;;  %v1016_v39 = vsel %vm652_vm2, %v1010_v37, -inf }
 0x6a0   : > { %1017 = vmax.xlane.f32.xlu1 %v1016_v39  ;;  %v1013_v40 = vpop.f32.mrb[14].mxu1 }
 0x6a1   : > { %v2172_v41 = vpop.f32.mrb[15].mxu1 }
 0x6b1   : > { %1028 = vrot.lane.b32.xlu1 %v2727_v33, %s2491_s19  ;;  %s2993_s19 = sld [smem:[#allocation22_spill]] }
 0x6b5   : > { %1125 = vrot.lane.b32.xlu1 %v2727_v33, %s2492_s28 }
 0x6b7   : > { %v2003_v35 = vld [vmem:[%s2993_s19] ss:$0 sm:$0xff] }
 0x72d   : > { %v1018_v42 = vpop.xlane.xlu1 %1017 }
 0x72e   : > { %v1019_v43 = vsub.f32 %v1010_v37, %v1018_v42 }
 0x730   : > { %v1020_v44 = vmul.f32 1.442695, %v1019_v43 }
 0x731   : > { %v1029_v45 = vpop.permute.xlu1 %1028 }
 0x732   : > { %2316 = vpow2.f32 %v1020_v44  ;;  %v1034_v46 = vsel %vm716_vm3, %v1029_v45, 0 }
 0x733   : > { %2174 = vmatpush3.bf16.msra.mxu0 %v1034_v46 }
 0x734   : > { %2185 = vmatprep.subr.bf16.mxu0 %v2482_v16 }
 0x735   : > { %v1126_v55 = vpop.permute.xlu1 %1125 }
 0x73c   : > { %v2317_v47 = vpop.eup %2316 }
 0x73d   : > { %v1022_v48 = vsel %vm652_vm2, %v2317_v47, 0.0 }
 0x73e   : > { %1023 = vadd.xlane.f32.xlu0 %v1022_v48 }
 0x754   : > { %1127 = vrot.lane.b32.xlu0 %v2727_v33, %s2493_s16 }
 0x7cb   : > { %v1024_v49 = vpop.xlane.xlu0 %1023 }
 0x7cc   : > { %2318 = vrcp.f32 %v1024_v49  ;;  %v2002_v49 = vld [vmem:[%s2995_s29] ss:$0 sm:$0xff] }
 0x7cf   : > { %v1128_v52 = vpop.permute.xlu0 %1127 }
 0x7d0   : > { %v1133_v54 = vsel %vm652_vm2, %v1128_v52, 0 }
 0x7d6   : > { %v2319_v50 = vpop.eup %2318 }
 0x7d7   : > { %v1026_v51 = vmul.f32 %v2319_v50, %v2317_v47 }
 0x7d9   : > { %v1027_v53 = vpack.c.bf16 %v1026_v51, %v1026_v51 }
 0x7db   : > { %2176 = vmatmul.mubr.msk.bf16.vlgmr.msra.gmra.mrb[16].mxu0 %vm652_vm2, %v1027_v53 }
 0x7dc   : > { %2186 = vmatpush3.bf16.xpose.msra.mxu0 %v1133_v54  ;;  %2187 = vmatprep.mubr.msk.bf16.mxu0 %vm2483_vm1, %v2482_v16 }
 0x7dd   : > { %2197 = vmatprep.subr.bf16.mxu0 %v2482_v16 }
 0x7e3   : > { %2188 = vmatmul.mubr.msk.bf16.vlgmr.msra.gmra.mrb[20].mxu0 %vm652_vm2, %v1126_v55 }
 0x7e4   : > { %2199 = vmatprep.mubr.msk.bf16.mxu0 %vm2483_vm1, %v2482_v16 }
 0x8ae   : > { %v1070_v58 = vpop.f32.mrb[16].mxu0 }
 0x8af   : > { %v1076_v59 = vpack.c.bf16 %v1070_v58, %v1070_v58  ;;  %v2177_v60 = vpop.f32.mrb[17].mxu0 }
 0x8b0   : > { %v1073_v61 = vpop.f32.mrb[18].mxu0 }
 0x8b1   : > { %v2178_v62 = vpop.f32.mrb[19].mxu0  ;;  %2182 = vmatmul.mubr.msk.bf16.vlgmr.msra.gmra.mrb[16].mxu1 %vm652_vm2, %v1076_v59 }
 0x8b2   : > { %2193 = vmatprep.mubr.msk.bf16.mxu1 %vm2483_vm1, %v2482_v16 }
 0x8b6   : > { %v1169_v63 = vpop.f32.mrb[20].mxu0 }
 0x8b7   : > { %v2189_v0 = vpop.f32.mrb[21].mxu0  ;;  %v1175_v1 = vsel %vm652_vm2, %v1169_v63, -inf }
 0x8b8   : > { %1176 = vmax.xlane.f32.xlu1 %v1175_v1  ;;  %v1172_v2 = vpop.f32.mrb[22].mxu0 }
 0x8b9   : > { %v2190_v3 = vpop.f32.mrb[23].mxu0 }
 0x945   : > { %v1177_v4 = vpop.xlane.xlu1 %1176 }
 0x946   : > { %v1178_v5 = vsub.f32 %v1169_v63, %v1177_v4 }
 0x948   : > { %v1179_v6 = vmul.f32 1.442695, %v1178_v5 }
 0x94a   : > { %2320 = vpow2.f32 %v1179_v6 }
 0x954   : > { %v2321_v7 = vpop.eup %2320 }
 0x955   : > { %v1181_v9 = vsel %vm652_vm2, %v2321_v7, 0.0 }
 0x956   : > { %1182 = vadd.xlane.f32.xlu0 %v1181_v9 }
 0x96c   : > { %1187 = vrot.lane.b32.xlu0 %v2727_v33, %s2494_s27  ;;  %v1236_v33 = vld [vmem:[%s2952_s5 + $0xc] sm:$0xf] }
 0x96d   : > { %v1241_v21 = vsel %vm716_vm3, %v1236_v33, 0 }
 0x96e   : > { %2198 = vmatpush3.bf16.msra.mxu0 %v1241_v21 }
 0x984   : > { %v1118_v10 = vpop.f32.mrb[16].mxu1 }
 0x985   : > { %v1124_v16 = vadd.f32 %v1118_v10, %v2782_v32  ;;  %v2183_v11 = vpop.f32.mrb[17].mxu1 }
 0x986   : > { %v1121_v12 = vpop.f32.mrb[18].mxu1 }
 0x987   : > { %v2184_v13 = vpop.f32.mrb[19].mxu1 }
 0x9e3   : > { %v1183_v14 = vpop.xlane.xlu0 %1182 }
 0x9e4   : > { %2322 = vrcp.f32 %v1183_v14 }
 0x9e7   : > { %v1188_v15 = vpop.permute.xlu0 %1187 }
 0x9e8   : > { %v1193_v17 = vsel %vm716_vm3, %v1188_v15, 0 }
 0x9e9   : > { %2192 = vmatpush3.bf16.msra.mxu1 %v1193_v17 }
 0x9ee   : > { %v2323_v18 = vpop.eup %2322 }
 0x9ef   : > { %v1185_v19 = vmul.f32 %v2323_v18, %v2321_v7 }
 0x9f1   : > { %v1186_v20 = vpack.c.bf16 %v1185_v19, %v1185_v19 }
 0x9f3   : > { %2194 = vmatmul.mubr.msk.bf16.vlgmr.msra.gmra.mrb[20].mxu1 %vm652_vm2, %v1186_v20 }
 0xac6   : > { %v1229_v22 = vpop.f32.mrb[20].mxu1 }
 0xac7   : > { %v1235_v23 = vpack.c.bf16 %v1229_v22, %v1229_v22  ;;  %v2195_v24 = vpop.f32.mrb[21].mxu1 }
 0xac8   : > { %v1232_v25 = vpop.f32.mrb[22].mxu1 }
 0xac9   : > { %v2196_v26 = vpop.f32.mrb[23].mxu1  ;;  %2200 = vmatmul.mubr.msk.bf16.vlgmr.msra.gmra.mrb[24].mxu0 %vm652_vm2, %v1235_v23 }
 0xb9c   : > { %v1277_v27 = vpop.f32.mrb[24].mxu0 }
 0xb9d   : > { %v1283_v29 = vadd.f32 %v1277_v27, %v1124_v16  ;;  %v2201_v30 = vpop.f32.mrb[25].mxu0 }
 0xb9e   : > { %v1280_v31 = vpop.f32.mrb[26].mxu0 }
 0xb9f   : > { %v1291_v32 = vadd.f32 %v2000_v28, %v1283_v29  ;;  %v2202_v34 = vpop.f32.mrb[27].mxu0 }
 0xba1   : > { %v1292_v36 = vadd.f32 %v1291_v32, %v2695_v8  ;;  %v2001_v8 = vld [vmem:[%s2994_s8] ss:$0 sm:$0xff] }
 0xba3   : > { %v1332_v37 = vadd.f32 %v2003_v35, %v1292_v36  ;;  %v1293_v38 = vsel %vm550_vm0, %v1292_v36, 0.0 }
 0xba4   : > { %1294 = vadd.xlane.f32.xlu1 %v1293_v38 }
 0xba5   : > { %1333 = vst.msk [vmem:[#allocation3] sm:$0xff] %vm550_vm0, %v1332_v37 }
 0xc31   : > { %v1295_v39 = vpop.xlane.xlu1 %1294 }
 0xc32   : > { %v1296_v40 = vmul.f32 0.03125, %v1295_v39 }
 0xc34   : > { %v1297_v41 = vsub.f32 %v1292_v36, %v1296_v40 }
 0xc36   : > { %v1298_v42 = vmul.f32 %v1297_v41, %v1297_v41 }
 0xc38   : > { %v1299_v43 = vsel %vm550_vm0, %v1298_v42, 0.0 }
 0xc39   : > { %1300 = vadd.xlane.f32.xlu1 %v1299_v43 }
 0xcc6   : > { %v1301_v44 = vpop.xlane.xlu1 %1300 }
 0xcc7   : > { %v1302_v45 = vmul.f32 0.03125, %v1301_v44 }
 0xcc9   : > { %v1303_v46 = vadd.f32 1e-06, %v1302_v45 }
 0xccb   : > { %2324 = vrsqrt.f32 %v1303_v46 }
 0xcd5   : > { %v2325_v47 = vpop.eup %2324 }
 0xcd6   : > { %v1305_v48 = vmul.f32 %v2325_v47, %v1297_v41 }
 0xcd8   : > { %v1313_v50 = vmul.f32 %v2001_v8, %v1305_v48 }
 0xcda   : > { %v1321_v51 = vadd.f32 %v2002_v49, %v1313_v50 }
 0xcdc   : > { %v1322_v52 = vpack.c.bf16 %v1321_v51, %v1321_v51 }
 0xcde   : > { %1324 = vst.msk [vmem:[#allocation2] sm:$0xf] %vm1323_vm4, %v1322_v52 }
 0xcdf PF: > { %v2326_v53 = vld [vmem:[%s2691_s25 + $0x4] ss:$16 sps:$4 sm:$0xff]   ;;  %v2328_v54 = vld [vmem:[%s2691_s25 + $0xc] ss:$16 sps:$4 sm:$0xff]   ;;  %v2495_v55 = vmov 0   ;;  %vm1405_vm5 = vcmask 261120   ;;  %v1345_v31 = vlaneseq }
 0xce0   : > { %1441 = vmatprep.mubr.bf16.mxu0 %v2495_v55  ;;  %1482 = vmatprep.mubr.bf16.mxu1 %v2495_v55  ;;  %v2330_v56 = vld [vmem:[%s2691_s25] ss:$16 sps:$4 sm:$0xff]   ;;  %v2331_v57 = vld [vmem:[%s2691_s25 + $0x8] ss:$16 sps:$4 sm:$0xff]   ;;  %v2332_v58 = vld [vmem:[%s2691_s25 + $0x24] ss:$16 sps:$4 sm:$0xff]  }
 0xce1   : > { %1409 = vmatprep.subr.bf16.mxu0 %v2326_v53  ;;  %1450 = vmatprep.subr.bf16.mxu1 %v2328_v54  ;;  %v2334_v59 = vld [vmem:[%s2691_s25 + $0x2c] ss:$16 sps:$4 sm:$0xff]   ;;  %v2336_v60 = vld [vmem:[%s2691_s25 + $0x20] ss:$16 sps:$4 sm:$0xff]   ;;  %v2337_v61 = vld [vmem:[%s2691_s25 + $0x28] ss:$16 sps:$4 sm:$0xff]  }
 0xce2   : > { %1410 = vmatpush1.bf16.msra.mxu0 %v2330_v56  ;;  %1451 = vmatpush1.bf16.msra.mxu1 %v2331_v57  ;;  %v2338_v63 = vld [vmem:[%s2689_s23 + $0x40] sm:$0xff]   ;;  %v2342_v3 = vld [vmem:[%s2689_s23 + $0x48] sm:$0xff]   ;;  %v2346_v7 = vld [vmem:[%s2689_s23 + $0x50] sm:$0xff]   ;;  %v1346_v32 = vshrl.u32 %v1345_v31, 7  ;;  %p2046_p7 = scmp.ne.s32.totalorder %s2464_s30, 3 }
 0xce3   : > { %1411 = vmatprep.subr.bf16.mxu0 %v2332_v58  ;;  %1452 = vmatprep.subr.bf16.mxu1 %v2334_v59  ;;  %v2339_v0 = vld [vmem:[%s2689_s23 + $0xc0] sm:$0xff]   ;;  %v2343_v4 = vld [vmem:[%s2689_s23 + $0xc8] sm:$0xff]   ;;  %v2347_v9 = vld [vmem:[%s2689_s23 + $0xd0] sm:$0xff]  }
 0xce4   : > { %v2340_v1 = vld [vmem:[%s2689_s23] sm:$0xff]   ;;  %v2344_v5 = vld [vmem:[%s2689_s23 + $0x8] sm:$0xff]   ;;  %v2348_v10 = vld [vmem:[%s2689_s23 + $0x10] sm:$0xff]   ;;  %v1347_v34 = vsub.s32 0, %v1346_v32  ;;  %v1355_v35 = vsub.s32 2, %v1346_v32  ;;  %v1351_v37 = vsub.s32 1, %v1346_v32 }
 0xce5   : > { %v1334_v62 = vld [vmem:[#allocation2] sm:$0xf]  ;;  %v2345_v6 = vld [vmem:[%s2689_s23 + $0x88] sm:$0xff]   ;;  %v2349_v16 = vld [vmem:[%s2689_s23 + $0x90] sm:$0xff]   ;;  %v1359_v38 = vsub.s32 3, %v1346_v32 }
 0xce6   : > { %1412 = vmatpush1.bf16.msra.mxu0 %v2336_v60  ;;  %1453 = vmatpush1.bf16.msra.mxu1 %v2337_v61  ;;  %v2341_v2 = vld [vmem:[%s2689_s23 + $0x80] sm:$0xff]   ;;  %v2350_v11 = vld [vmem:[%s2689_s23 + $0x58] sm:$0xff]   ;;  %v2358_v20 = vld [vmem:[%s2689_s23 + $0x68] sm:$0xff]  }
 0xce7   : > { %2079 = vmatprep.subr.bf16.mxu0 %v2338_v63  ;;  %2101 = vmatprep.subr.bf16.mxu1 %v2339_v0  ;;  %v2351_v12 = vld [vmem:[%s2689_s23 + $0xd8] sm:$0xff]   ;;  %v2354_v15 = vld [vmem:[%s2689_s23 + $0x60] sm:$0xff]   ;;  %v2359_v33 = vld [vmem:[%s2689_s23 + $0xe8] sm:$0xff]  }
 0xce8   : > { %v2352_v13 = vld [vmem:[%s2689_s23 + $0x18] sm:$0xff]   ;;  %v2355_v17 = vld [vmem:[%s2689_s23 + $0xe0] sm:$0xff]   ;;  %v2360_v21 = vld [vmem:[%s2689_s23 + $0x28] sm:$0xff]  }
 0xce9   : > { %2012 = vmatmul.mubr.msk.bf16.vlgmr.msra.gmra.mrb[0].mxu0 %vm1405_vm5, %v1334_v62  ;;  %2013 = vmatmul.mubr.msk.bf16.vlgmr.msra.gmra.mrb[0].mxu1 %vm1405_vm5, %v1334_v62  ;;  %v2353_v14 = vld [vmem:[%s2689_s23 + $0x98] sm:$0xff]   ;;  %v2356_v18 = vld [vmem:[%s2689_s23 + $0x20] sm:$0xff]   ;;  %v2361_v22 = vld [vmem:[%s2689_s23 + $0xa8] sm:$0xff]  }
 0xcea   : > { %2080 = vmatpush3.bf16.msra.mxu0 %v2340_v1  ;;  %2102 = vmatpush3.bf16.msra.mxu1 %v2341_v2  ;;  %v2357_v19 = vld [vmem:[%s2689_s23 + $0xa0] sm:$0xff]   ;;  %v2362_v23 = vld [vmem:[%s2689_s23 + $0x70] sm:$0xff]   ;;  %v2366_v27 = vld [vmem:[%s2689_s23 + $0x78] sm:$0xff]  }
 0xceb   : > { %2081 = vmatprep.subr.bf16.mxu0 %v2342_v3  ;;  %2103 = vmatprep.subr.bf16.mxu1 %v2343_v4  ;;  %v2363_v24 = vld [vmem:[%s2689_s23 + $0xf0] sm:$0xff]   ;;  %v2367_v28 = vld [vmem:[%s2689_s23 + $0xf8] sm:$0xff]   ;;  %v1343_v36 = vld [vmem:[%s536_s21] sm:$0xf] }
 0xcec   : > { %v2364_v25 = vld [vmem:[%s2689_s23 + $0x30] sm:$0xff]   ;;  %v2368_v29 = vld [vmem:[%s2689_s23 + $0x38] sm:$0xff]   ;;  %v1348_v39 = vrot.slane %v1343_v36, %v1347_v34  ;;  %v1356_v40 = vrot.slane %v1343_v36, %v1355_v35  ;;  %v1352_v41 = vrot.slane %v1343_v36, %v1351_v37  ;;  %v1360_v42 = vrot.slane %v1343_v36, %v1359_v38 }
 0xced   : > { %v2365_v26 = vld [vmem:[%s2689_s23 + $0xb0] sm:$0xff]   ;;  %v2369_v30 = vld [vmem:[%s2689_s23 + $0xb8] sm:$0xff]  }
 0xcee   : > { %2082 = vmatpush3.bf16.msra.mxu0 %v2344_v5  ;;  %2104 = vmatpush3.bf16.msra.mxu1 %v2345_v6  ;;  %v1495_v6 = vld [vmem:[#allocation3] sm:$0xff] }
 0xcef   : > { %2083 = vmatprep.subr.bf16.mxu0 %v2346_v7  ;;  %2105 = vmatprep.subr.bf16.mxu1 %v2347_v9 }
 0xcf2   : > { %2084 = vmatpush3.bf16.msra.mxu0 %v2348_v10  ;;  %2106 = vmatpush3.bf16.msra.mxu1 %v2349_v16 }
 0xcf3   : > { %2085 = vmatprep.subr.bf16.mxu0 %v2350_v11  ;;  %2107 = vmatprep.subr.bf16.mxu1 %v2351_v12 }
 0xcf6   : > { %2086 = vmatpush3.bf16.msra.mxu0 %v2352_v13  ;;  %2108 = vmatpush3.bf16.msra.mxu1 %v2353_v14 }
 0xcf7   : > { %2087 = vmatprep.subr.bf16.mxu0 %v2354_v15  ;;  %2109 = vmatprep.subr.bf16.mxu1 %v2355_v17 }
 0xcfa   : > { %2088 = vmatpush3.bf16.msra.mxu0 %v2356_v18  ;;  %2110 = vmatpush3.bf16.msra.mxu1 %v2357_v19 }
 0xcfb   : > { %2089 = vmatprep.subr.bf16.mxu0 %v2358_v20  ;;  %2111 = vmatprep.subr.bf16.mxu1 %v2359_v33 }
 0xcfe   : > { %2090 = vmatpush3.bf16.msra.mxu0 %v2360_v21  ;;  %2112 = vmatpush3.bf16.msra.mxu1 %v2361_v22 }
 0xcff   : > { %2091 = vmatprep.subr.bf16.mxu0 %v2362_v23  ;;  %2113 = vmatprep.subr.bf16.mxu1 %v2363_v24 }
 0xd02   : > { %2092 = vmatpush3.bf16.msra.mxu0 %v2364_v25  ;;  %2114 = vmatpush3.bf16.msra.mxu1 %v2365_v26 }
 0xd03   : > { %2093 = vmatprep.subr.bf16.mxu0 %v2366_v27  ;;  %2115 = vmatprep.subr.bf16.mxu1 %v2367_v28 }
 0xd06   : > { %2094 = vmatpush3.bf16.msra.mxu0 %v2368_v29  ;;  %2116 = vmatpush3.bf16.msra.mxu1 %v2369_v30 }
 0xdbc   : > { %v1443_v43 = vpop.f32.mrb[0].mxu0  ;;  %v1484_v44 = vpop.f32.mrb[0].mxu1 }
 0xdbd   : > { %v1444_v45 = vadd.f32 %v1443_v43, %v1348_v39  ;;  %v1485_v46 = vadd.f32 %v1484_v44, %v1356_v40  ;;  %v1445_v47 = vpop.f32.mrb[1].mxu0  ;;  %v1486_v8 = vpop.f32.mrb[1].mxu1 }
 0xdbe   : > { %v1446_v48 = vadd.f32 %v1445_v47, %v1352_v41  ;;  %v1487_v49 = vadd.f32 %v1486_v8, %v1360_v42  ;;  %v1447_v50 = vpop.f32.mrb[2].mxu0  ;;  %v1488_v51 = vpop.f32.mrb[2].mxu1 }
 0xdbf   : > { %v1491_v52 = vmax.f32 %v1444_v45, 0.0  ;;  %v1493_v53 = vmax.f32 %v1485_v46, 0.0  ;;  %v1448_v54 = vpop.f32.mrb[3].mxu0  ;;  %v1489_v55 = vpop.f32.mrb[3].mxu1 }
 0xdc0   : > { %v1492_v56 = vmax.f32 %v1446_v48, 0.0  ;;  %v1494_v57 = vmax.f32 %v1487_v49, 0.0 }
 0xdc1   : > { %v1496_v60 = vpack.c.bf16 %v1491_v52, %v1491_v52  ;;  %v1498_v61 = vpack.c.bf16 %v1493_v53, %v1493_v53 }
 0xdc2   : > { %v1497_v58 = vpack.c.bf16 %v1492_v56, %v1492_v56  ;;  %v1499_v59 = vpack.c.bf16 %v1494_v57, %v1494_v57 }
 0xdc4   : > { %1788 = vmatprep.mubr.bf16.mxu0 %v1497_v58  ;;  %1828 = vmatprep.mubr.bf16.mxu1 %v1499_v59 }
 0xdc5   : > { %1789 = vmatmul.mubr.bf16.vlgmr.msra.gmra.mrb[4].mxu0 %v1496_v60  ;;  %1829 = vmatmul.mubr.bf16.vlgmr.msra.gmra.mrb[4].mxu1 %v1498_v61 }
 0xe98   : > { %v2095_v62 = vpop.f32.mrb[4].mxu0  ;;  %v2117_v63 = vpop.f32.mrb[4].mxu1 }
 0xe99   : > { %v2096_v0 = vpop.f32.mrb[5].mxu0  ;;  %v2118_v1 = vpop.f32.mrb[5].mxu1 }
 0xe9a   : > { %v2097_v2 = vadd.f32 %v2096_v0, %v2095_v62  ;;  %v2119_v3 = vadd.f32 %v2118_v1, %v2117_v63  ;;  %v2098_v4 = vpop.f32.mrb[6].mxu0  ;;  %v2120_v5 = vpop.f32.mrb[6].mxu1  ;;  %1841 = sbr.rel (%p2046_p7) target bundleno = 3753 (0xea9), region = 103 }
 0xe9b   : > { %v2099_v7 = vpop.f32.mrb[7].mxu0  ;;  %v2121_v9 = vpop.f32.mrb[7].mxu1 }
 0xe9c   : > { %v1831_v10 = vadd.f32 %v2119_v3, %v2097_v2 }
 0xe9e   : > { %v1836_v16 = vadd.f32 %v1831_v10, %v1495_v6 }
 0xea0   : > { %1837 = vst.msk [vmem:[#allocation3] sm:$0xff] %vm1405_vm5, %v1836_v16 }
 0xea7   : > { %v1842_v11 = vld [vmem:[#allocation3] sm:$0xff] }
 0xea8   : > { %1843 = vst.msk [vmem:[%s527_s17] sm:$0xff] %vm1405_vm5, %v1842_v11 }
 0xea9 PF: > { %s2048_s23 = sshll.u32 %s2468_s14, 7  ;;  %s2996_s20 = sld [smem:[#allocation23_spill]] }
 0xeaa   : > { %s1858_s22 = sshll.u32 %s527_s17, 4  ;;  %s2997_s30 = sand.u32 1, %s2448_s26   ;;  %s1859_s22 = int_to_ptr.vmem [resolvable:$true] %s1858_s22 }
 0xeab   : > { %s1845_s13 = scalar_lea.sflag [#allocation6], %s2997_s30  ;;  %s2370_s19 = scalar_lea.vmem %s1859_s22, 128 }
 0xeac   : > { %p2371_p8 = scmp.ne.s32.totalorder %s1859_s22, %s2370_s19  ;;  %s2496_s28 = smov [#allocation5]  }
 0xead   : > { %s2374_s16 = sshll.u32 %s2496_s28, 4  ;;  %s2375_s16 = int_to_ptr.vmem [resolvable:$false] %s2374_s16 }
 0xeae   : > { %p2372_p9 = pnand %p2371_p8, %p2646_p10  ;;  %s2376_s8 = scalar_lea.vmem %s2375_s16, 256 }
 0xeaf   : > { %s2890_s24 = scalar_lea.hbm %s2996_s20, %s2048_s23  ;;  %p2377_p13 = scmp.lt.s32.totalorder %s1859_s22, %s2375_s16 }
 0xeb0   : > { %p2373_p11 = pneg %p2372_p9  ;;  %p2378_p0 = scmp.lt.s32.totalorder %s2376_s8, %s2370_s19 }
 0xeb2   : > { %p2379_p1 = por %p2378_p0, %p2377_p13 }
 0xeb4   : > { %p2380_p2 = pnand %p2379_p1, %p2373_p11 }
 0xeb6   : > { %2383 = shalt.err (!%p2380_p2)
}
 0xeb7   : > { %s2384_s14 = scalar_lea.hbm %s2890_s24, 128  ;;  %s2388_s9 = scalar_lea.hbm %s2996_s20, 256 }
 0xeb8   : > { %p2385_p3 = scmp.ne.s32.totalorder %s2890_s24, %s2384_s14  ;;  %p2389_p6 = scmp.lt.u32.totalorder %s2890_s24, %s2996_s20 }
 0xeb9   : > { %p2390_p7 = scmp.lt.u32.totalorder %s2388_s9, %s2384_s14  ;;  %p2392_p9 = scmp.lt.u32.totalorder %s2384_s14, %s2890_s24 }
 0xeba   : > { %p2386_p4 = pnand %p2385_p3, %p2646_p10 }
 0xebb   : > { %p2391_p8 = por %p2390_p7, %p2389_p6 }
 0xebc   : > { %p2387_p5 = pneg %p2386_p4 }
 0xebd   : > { %p2393_p11 = por %p2392_p9, %p2391_p8 }
 0xebf   : > { %p2394_p13 = pnand %p2393_p11, %p2387_p5 }
 0xec1   : > { %2397 = shalt.err (!%p2394_p13)
}
 0xec2   : > { %2203 = dma.vmem_to_hbm [thread:$0]  (%p2646_p10), %s1859_s22, 128, %s2890_s24, %s1845_s13  }
 0xec3 PF: > { %s2998_s25 = sld [smem:[#allocation13_spill]]  ;;  %s2999_s15 = sld [smem:[#allocation8_spill]] }
 0xec9   : > { %p2209_p0 = scmp.ge.s32.totalorder %s2998_s25, 2  ;;  %s1870_s21 = sand.u32 1, %s2999_s15  }
 0xeca   : > { %s1871_s18 = scalar_lea.sflag [#allocation6], %s1870_s21 }
 0xecb   : > { %p2206_p1 = pnand %p2209_p0, %p2653_p12 }
 0xecd   : > { %2439 = dma.done.wait (!%p2206_p1), %s1871_s18, 128  }
 0xece   : > { %2441 = vsyncadd (!%p2206_p1), %s1871_s18, 4294967168  ;;  %s26_s17 = sadd.s32 1, %s2998_s25   ;;  %s3001_s30 = sld [smem:[#allocation9_spill]] }
 0xecf   : > { %p23_p2 = scmp.ge.s32.totalorder %s26_s17, 10   ;;  %s3002_s27 = sld [smem:[#allocation17_spill]] }
 0xed0   : > { %s3003_s28 = sld [smem:[#allocation10_spill]]  ;;  %s3004_s29 = sld [smem:[#allocation16_spill]] }
 0xed1   : > { %s3005_s12 = sld [smem:[#allocation11_spill]]  ;;  %s3006_s14 = sld [smem:[#allocation12_spill]] }
 0xed2   : > { %s3007_s15 = sld [smem:[#allocation14_spill]]  ;;  %s3008_s16 = sld [smem:[#allocation15_spill]] }
 0xed3   : > { %s3009_s25 = smov %s2448_s26  ;;  %25 = sbr.rel (!%p23_p2) target bundleno = 12 (0xc), region = 152 }
 0xed4   : > { %s3010_s26 = smov %s3001_s30 }
 0xed7   : > { %s3011_s30 = smov %s3005_s12 }
 0xeda   :  { %1876 = vsyncpa [#allocation6], 1 }
 0xedb   :  { %1878 = vsyncpa [#allocation6 + $0x1], 1 }

</bundles_post_ra>
